<compile_context>
chip_gen: v5e
topology: v5e:2x2
jax: 0.10.0
libtpu: 0.0.40
codegen_flags: <defaults>
</compile_context>

<pallas_src>
import jax
import jax.numpy as jnp
from jax.experimental import pallas as pl
from jax.experimental.pallas import tpu as pltpu

EPS = 1e-5  # LayerNorm2d eps (nn.LayerNorm default)


def _proj_kernel(x_ref, g_ref, b_ref, cw_ref, bias_ref, o_ref, lhs_ref):
    # x_ref:    (NB, Cin, H, W)        input images for this grid step, f32
    # g_ref:    (1, Cin, 1, 1)         LayerNorm gamma
    # b_ref:    (1, Cin, 1, 1)         LayerNorm beta
    # cw_ref:   (Cin, 3W, mult*Wo)     bf16 column weights, 3 ky taps along K
    # bias_ref: (Cin, 1, mult*Wo)      conv bias in the lane-dense output layout
    # o_ref:    (Cin, NB*Ho, mult*Wo)  output block, f32
    # lhs_ref:  (Cin, NB*Ho, 3W)       VMEM scratch: fused im2row LHS
    nb, cin, H, W = x_ref.shape
    Ho = (H + 1) // 2           # output rows per image (ks=3, stride=2, pad=1)
    n_odd = H // 2              # number of real odd input rows

    g = g_ref[...]
    b = b_ref[...]

    def ln_gelu(v):
        # LayerNorm2d: per-pixel statistics over the channel axis, then affine.
        mean = jnp.mean(v, axis=1, keepdims=True)
        cen = v - mean
        var = jnp.mean(cen * cen, axis=1, keepdims=True)
        vn = cen * jax.lax.rsqrt(var + EPS) * g + b
        # TODO(synk): torch.nn.GELU defaults to exact erf; tanh approximation is
        # used here (documented deviation, ~1e-3 max abs error).
        return jax.nn.gelu(vn, approximate=True)

    # Output row y reads padded rows 2y, 2y+1, 2y+2  ==  act rows 2y-1, 2y, 2y+1.
    # Even rows feed the ky=1 tap, odd rows feed ky=0 (shifted one output row)
    # and ky=2.  LN/GELU are per-pixel, so they are applied to the strided row
    # slabs directly -- no padded-activation round trip through VMEM.
    ae = ln_gelu(x_ref[:, :, pl.ds(0, Ho, stride=2), :])          # (NB,Cin,Ho,W)
    if n_odd > 0:
        ao = ln_gelu(x_ref[:, :, pl.ds(1, n_odd, stride=2), :])   # (NB,Cin,n_odd,W)

    zrow = jnp.zeros((cin, 1, W), jnp.float32)

    # Fill the fused im2row LHS.  The static per-image loop only issues stores
    # (all compute below is a single fused matmul); when Ho % 8 == 0 the slab
    # stores are 8-sublane aligned.
    for n in range(nb):
        r0 = n * Ho
        # ky=1 tap (even rows) -> K columns [W, 2W)
        lhs_ref[:, pl.ds(r0, Ho), W:2 * W] = ae[n]
        # ky=2 tap (odd rows; bottom zero pad row only if H is odd) -> [2W, 3W)
        if n_odd > 0:
            lhs_ref[:, pl.ds(r0, n_odd), 2 * W:3 * W] = ao[n]
        if n_odd < Ho:
            lhs_ref[:, pl.ds(r0 + n_odd, 1), 2 * W:3 * W] = zrow
        # ky=0 tap (odd rows shifted down one output row, zero guard on top) -> [0, W)
        lhs_ref[:, pl.ds(r0, 1), 0:W] = zrow
        if Ho > 1:
            lhs_ref[:, pl.ds(r0 + 1, Ho - 1), 0:W] = ao[n][:, :Ho - 1, :]

    # One channel-batched MXU contraction per grid step:
    #   (Cin, NB*Ho, 3W) x (Cin, 3W, mult*Wo) -> (Cin, NB*Ho, mult*Wo)
    acc = jax.lax.dot_general(
        lhs_ref[...].astype(jnp.bfloat16), cw_ref[...],
        dimension_numbers=(((2,), (1,)), ((0,), (0,))),
        preferred_element_type=jnp.float32)

    # Bias folded into the single lane-dense store.
    # (Output kept f32; switch to bf16 if the downstream ConvAttBlock tolerates it.)
    o_ref[...] = (acc + bias_ref[...]).astype(o_ref.dtype)


def _build_conv_matrix(w, cin, mult, W, Wo):
    """Column-weight matrix encoding kx taps + left/right zero padding, with the
    three ky taps concatenated along the contraction dim:

    cw[c, ky*W + j, m*Wo + x] = w[c*mult+m, ky, j - (2x-1)]  if the tap is valid,
    else 0.  (ks=3, stride=2, padding=1 only.)
    """
    js = jnp.arange(W)[:, None]
    xs = jnp.arange(Wo)[None, :]
    kx = js - (2 * xs - 1)                                   # (W, Wo)
    valid = (kx >= 0) & (kx < 3)
    kxc = jnp.clip(kx, 0, 2)
    cw_full = jnp.where(valid[None, None, :, :], w[:, :, kxc], 0.0)  # (Cout,3,W,Wo)
    cw = (cw_full.reshape(cin, mult, 3, W, Wo)
          .transpose(0, 2, 3, 1, 4)                          # (Cin, 3, W, mult, Wo)
          .reshape(cin, 3 * W, mult * Wo))
    return cw


def _pick_images_per_step(n_images, ho, per_image_bytes, budget_bytes):
    """Pick NB: divides N, keeps the output BlockSpec tiling-compliant
    (second-minor block dim multiple of 8 or full), fits the VMEM budget, and
    prefers >=2 grid steps (megacore / pipeline overlap)."""
    divisors = [d for d in range(1, n_images + 1) if n_images % d == 0]
    ok = [d for d in divisors if d == n_images or (d * ho) % 8 == 0]
    fits = [d for d in ok if d * per_image_bytes <= budget_bytes] or [min(ok)]
    multi = [d for d in fits if n_images // d >= 2]
    return max(multi) if multi else max(fits)


def projection_apply(x, params, *, images_per_step=None,
                     vmem_budget_bytes=24 * 1024 * 1024):
    """LayerNorm2d -> GELU -> grouped conv (ks=3, s=2, p=1) on NCHW x."""
    gamma, beta, w, bias = params["gamma"], params["beta"], params["w"], params["bias"]
    x = x.astype(jnp.float32)
    N, cin, H, W = x.shape
    cout = w.shape[0]
    assert cout % cin == 0, "groups=Cin requires Cout % Cin == 0"
    mult = cout // cin
    Ho = (H + 2 - 3) // 2 + 1
    Wo = (W + 2 - 3) // 2 + 1
    MWo = mult * Wo

    # Rough per-image VMEM footprint: double-buffered in/out blocks, im2row
    # scratch, and live elementwise values.
    in_b = cin * H * W * 4
    mid_b = cin * Ho * 3 * W * 4
    out_b = cin * Ho * MWo * 4
    per_image = 4 * in_b + 2 * mid_b + 3 * out_b

    if (images_per_step is not None and N % images_per_step == 0
            and (images_per_step == N or (images_per_step * Ho) % 8 == 0)):
        nb = images_per_step
    else:
        nb = _pick_images_per_step(N, Ho, per_image, vmem_budget_bytes)
    grid = (N // nb,)

    # Conv constants: column weights shipped as bf16 (half the VMEM/HBM
    # footprint; full-rate MXU), bias pre-arranged lane-dense.  Constant
    # index_maps mean they are DMA'd once, not per step.
    cw = _build_conv_matrix(w, cin, mult, W, Wo).astype(jnp.bfloat16)
    bias_mw = jnp.broadcast_to(
        bias.reshape(cin, mult, 1), (cin, mult, Wo)
    ).reshape(cin, 1, MWo).astype(jnp.float32)
    g4 = gamma.reshape(1, cin, 1, 1).astype(jnp.float32)
    b4 = beta.reshape(1, cin, 1, 1).astype(jnp.float32)

    # Explicit VMEM limit (v5e scoped default is 16 MiB, v6e/v7x 32 MiB).
    const_b = cw.size * 2 * 2 + bias_mw.size * 4 * 2 + 16 * cin
    need = nb * per_image + const_b + (1 << 20)
    vmem_limit = int(min(64 * 1024 * 1024, max(32 * 1024 * 1024, 2 * need)))

    # Advisory cost so XLA schedules/overlaps this small call sensibly.
    conv_flops = 2 * cin * (N * Ho) * (3 * W) * MWo
    ln_gelu_flops = 25 * N * cin * H * W
    bytes_accessed = (x.size * 4 + cin * N * Ho * MWo * 4
                      + cw.size * 2 + bias_mw.size * 4 + 8 * cin)
    cost = pl.CostEstimate(flops=conv_flops + ln_gelu_flops,
                           transcendentals=N * cin * H * W,
                           bytes_accessed=bytes_accessed)

    out3 = pl.pallas_call(
        _proj_kernel,
        out_shape=jax.ShapeDtypeStruct((cin, N * Ho, MWo), jnp.float32),
        grid=grid,
        in_specs=[
            pl.BlockSpec((nb, cin, H, W), lambda i: (i, 0, 0, 0)),
            pl.BlockSpec((1, cin, 1, 1), lambda i: (0, 0, 0, 0)),
            pl.BlockSpec((1, cin, 1, 1), lambda i: (0, 0, 0, 0)),
            pl.BlockSpec((cin, 3 * W, MWo), lambda i: (0, 0, 0)),
            pl.BlockSpec((cin, 1, MWo), lambda i: (0, 0, 0)),
        ],
        out_specs=pl.BlockSpec((cin, nb * Ho, MWo), lambda i: (0, i, 0)),
        scratch_shapes=[pltpu.VMEM((cin, nb * Ho, 3 * W), jnp.float32)],
        compiler_params=pltpu.CompilerParams(
            dimension_semantics=("parallel",),
            vmem_limit_bytes=vmem_limit),
        cost_estimate=cost,
    )(x, g4, b4, cw, bias_mw)

    # Kernel emits (Cin, N*Ho, mult*Wo); un-interleave to (N, Cout, Ho, Wo)
    # outside the kernel (cheap XLA reshape/transpose).
    out = (out3.reshape(cin, N, Ho, mult, Wo)
           .transpose(1, 0, 3, 2, 4)
           .reshape(N, cout, Ho, Wo))
    return out


def projection_forward(xs, params):
    """Projection.forward: the same proj applied to (cls_tokens, patch_tokens)."""
    cls_tokens, patch_tokens = xs
    return projection_apply(cls_tokens, params), projection_apply(patch_tokens, params)


def make_projection_params(key, cin, cout):
    k1, k2, k3, k4 = jax.random.split(key, 4)
    return dict(
        gamma=1.0 + 0.1 * jax.random.normal(k1, (cin,), jnp.float32),
        beta=0.1 * jax.random.normal(k2, (cin,), jnp.float32),
        # Conv2d weight is (Cout, Cin/groups=1, 3, 3); stored squeezed (Cout,3,3).
        w=0.2 * jax.random.normal(k3, (cout, 3, 3), jnp.float32),
        bias=0.1 * jax.random.normal(k4, (cout,), jnp.float32),
    )


def _reference(x, params):
    """Plain-JAX reference of the same forward (correctness check)."""
    gamma, beta, w, bias = params["gamma"], params["beta"], params["w"], params["bias"]
    cin = x.shape[1]
    mean = jnp.mean(x, axis=1, keepdims=True)
    var = jnp.mean((x - mean) ** 2, axis=1, keepdims=True)
    xn = (x - mean) / jnp.sqrt(var + EPS)
    xn = xn * gamma.reshape(1, -1, 1, 1) + beta.reshape(1, -1, 1, 1)
    a = jax.nn.gelu(xn, approximate=True)
    out = jax.lax.conv_general_dilated(
        a, w[:, None, :, :], window_strides=(2, 2), padding=((1, 1), (1, 1)),
        dimension_numbers=("NCHW", "OIHW", "NCHW"), feature_group_count=cin)
    return out + bias.reshape(1, -1, 1, 1)


if __name__ == "__main__":
    key = jax.random.PRNGKey(0)
    k_cls, k_patch, k_params = jax.random.split(key, 3)

    N, Cin, Cout = 4, 4, 8
    cls_tokens = jax.random.normal(k_cls, (N, Cin, 4, 4), jnp.float32)
    patch_tokens = jax.random.normal(k_patch, (N, Cin, 16, 16), jnp.float32)
    params = make_projection_params(k_params, Cin, Cout)

    cls_out, patch_out = projection_forward((cls_tokens, patch_tokens), params)
    jax.block_until_ready((cls_out, patch_out))

    ref_cls = _reference(cls_tokens, params)
    ref_patch = _reference(patch_tokens, params)

    assert cls_out.shape == (N, Cout, 2, 2) and patch_out.shape == (N, Cout, 8, 8)
    # Tolerance covers bf16 MXU operands with f32 accumulation.
    assert jnp.allclose(cls_out, ref_cls, atol=2e-2, rtol=2e-2)
    assert jnp.allclose(patch_out, ref_patch, atol=2e-2, rtol=2e-2)

    print("KERNEL_OK")
</pallas_src>

<mosaic_0001>
module attributes {stable_mosaic.version = 11 : i64} {
  func.func @_proj_kernel(%arg0: i32, %arg1: memref<4x4x4x4xf32, #tpu.memory_space<vmem>>, %arg2: memref<1x4x1x1xf32, #tpu.memory_space<vmem>>, %arg3: memref<1x4x1x1xf32, #tpu.memory_space<vmem>>, %arg4: memref<4x12x4xbf16, #tpu.memory_space<vmem>>, %arg5: memref<4x1x4xf32, #tpu.memory_space<vmem>>, %arg6: memref<4x8x4xf32, #tpu.memory_space<vmem>>, %arg7: memref<4x8x12xf32, #tpu.memory_space<vmem>>) attributes {dimension_semantics = [#tpu.dimension_semantics<parallel>], iteration_bounds = array<i64: 1>, scalar_prefetch = 0 : i64, scratch_operands = 1 : i64, tpu.core_type = #tpu.core_type<tc>, window_params = [{transform_indices = @transform_0, window_bounds = array<i64: 4, 4, 4, 4>}, {pipeline_mode = #tpu.pipeline_mode<synchronous>, transform_indices = @transform_1, window_bounds = array<i64: 1, 4, 1, 1>}, {pipeline_mode = #tpu.pipeline_mode<synchronous>, transform_indices = @transform_2, window_bounds = array<i64: 1, 4, 1, 1>}, {pipeline_mode = #tpu.pipeline_mode<synchronous>, transform_indices = @transform_3, window_bounds = array<i64: 4, 12, 4>}, {pipeline_mode = #tpu.pipeline_mode<synchronous>, transform_indices = @transform_4, window_bounds = array<i64: 4, 1, 4>}, {transform_indices = @transform_5, window_bounds = array<i64: 4, 8, 4>}]} {
    %c0 = arith.constant 0 : index
    %c0_0 = arith.constant 0 : index
    %c0_1 = arith.constant 0 : index
    %c0_2 = arith.constant 0 : index
    %0 = vector.load %arg2[%c0, %c0_0, %c0_1, %c0_2] : memref<1x4x1x1xf32, #tpu.memory_space<vmem>>, vector<1x4x1x1xf32>
    %c0_3 = arith.constant 0 : index
    %c0_4 = arith.constant 0 : index
    %c0_5 = arith.constant 0 : index
    %c0_6 = arith.constant 0 : index
    %1 = vector.load %arg3[%c0_3, %c0_4, %c0_5, %c0_6] : memref<1x4x1x1xf32, #tpu.memory_space<vmem>>, vector<1x4x1x1xf32>
    %c0_7 = arith.constant 0 : index
    %c0_8 = arith.constant 0 : index
    %c0_9 = arith.constant 0 : index
    %c0_10 = arith.constant 0 : index
    %2 = tpu.strided_load %arg1[%c0_7, %c0_8, %c0_9, %c0_10] {strides = array<i32: 1, 1, 2, 1>} : memref<4x4x4x4xf32, #tpu.memory_space<vmem>>, vector<4x4x2x4xf32>
    %cst = arith.constant dense<0.000000e+00> : vector<4x2x4xf32>
    %3 = vector.multi_reduction <add>, %2, %cst [1] : vector<4x4x2x4xf32> to vector<4x2x4xf32>
    %4 = vector.shape_cast %3 : vector<4x2x4xf32> to vector<4x1x2x4xf32>
    %cst_11 = arith.constant 4.000000e+00 : f32
    %5 = vector.broadcast %cst_11 : f32 to vector<4x1x2x4xf32>
    %6 = arith.divf %4, %5 : vector<4x1x2x4xf32>
    %7 = vector.broadcast %6 : vector<4x1x2x4xf32> to vector<4x4x2x4xf32>
    %8 = arith.subf %2, %7 : vector<4x4x2x4xf32>
    %9 = arith.mulf %8, %8 : vector<4x4x2x4xf32>
    %cst_12 = arith.constant dense<0.000000e+00> : vector<4x2x4xf32>
    %10 = vector.multi_reduction <add>, %9, %cst_12 [1] : vector<4x4x2x4xf32> to vector<4x2x4xf32>
    %11 = vector.shape_cast %10 : vector<4x2x4xf32> to vector<4x1x2x4xf32>
    %cst_13 = arith.constant 4.000000e+00 : f32
    %12 = vector.broadcast %cst_13 : f32 to vector<4x1x2x4xf32>
    %13 = arith.divf %11, %12 : vector<4x1x2x4xf32>
    %cst_14 = arith.constant 9.99999974E-6 : f32
    %14 = vector.broadcast %cst_14 : f32 to vector<4x1x2x4xf32>
    %15 = arith.addf %13, %14 : vector<4x1x2x4xf32>
    %16 = math.rsqrt %15 : vector<4x1x2x4xf32>
    %17 = vector.broadcast %16 : vector<4x1x2x4xf32> to vector<4x4x2x4xf32>
    %18 = arith.mulf %8, %17 : vector<4x4x2x4xf32>
    %19 = vector.broadcast %0 : vector<1x4x1x1xf32> to vector<4x4x2x4xf32>
    %20 = arith.mulf %18, %19 : vector<4x4x2x4xf32>
    %21 = vector.broadcast %1 : vector<1x4x1x1xf32> to vector<4x4x2x4xf32>
    %22 = arith.addf %20, %21 : vector<4x4x2x4xf32>
    %23 = arith.mulf %22, %22 : vector<4x4x2x4xf32>
    %24 = arith.mulf %22, %23 : vector<4x4x2x4xf32>
    %cst_15 = arith.constant 4.471500e-02 : f32
    %25 = vector.broadcast %cst_15 : f32 to vector<4x4x2x4xf32>
    %26 = arith.mulf %25, %24 : vector<4x4x2x4xf32>
    %27 = arith.addf %22, %26 : vector<4x4x2x4xf32>
    %cst_16 = arith.constant 0.797884583 : f32
    %28 = vector.broadcast %cst_16 : f32 to vector<4x4x2x4xf32>
    %29 = arith.mulf %28, %27 : vector<4x4x2x4xf32>
    %30 = math.tanh %29 : vector<4x4x2x4xf32>
    %cst_17 = arith.constant 1.000000e+00 : f32
    %31 = vector.broadcast %cst_17 : f32 to vector<4x4x2x4xf32>
    %32 = arith.addf %31, %30 : vector<4x4x2x4xf32>
    %cst_18 = arith.constant 5.000000e-01 : f32
    %33 = vector.broadcast %cst_18 : f32 to vector<4x4x2x4xf32>
    %34 = arith.mulf %33, %32 : vector<4x4x2x4xf32>
    %35 = arith.mulf %22, %34 : vector<4x4x2x4xf32>
    %c0_19 = arith.constant 0 : index
    %c0_20 = arith.constant 0 : index
    %c1 = arith.constant 1 : index
    %c0_21 = arith.constant 0 : index
    %36 = tpu.strided_load %arg1[%c0_19, %c0_20, %c1, %c0_21] {strides = array<i32: 1, 1, 2, 1>} : memref<4x4x4x4xf32, #tpu.memory_space<vmem>>, vector<4x4x2x4xf32>
    %cst_22 = arith.constant dense<0.000000e+00> : vector<4x2x4xf32>
    %37 = vector.multi_reduction <add>, %36, %cst_22 [1] : vector<4x4x2x4xf32> to vector<4x2x4xf32>
    %38 = vector.shape_cast %37 : vector<4x2x4xf32> to vector<4x1x2x4xf32>
    %cst_23 = arith.constant 4.000000e+00 : f32
    %39 = vector.broadcast %cst_23 : f32 to vector<4x1x2x4xf32>
    %40 = arith.divf %38, %39 : vector<4x1x2x4xf32>
    %41 = vector.broadcast %40 : vector<4x1x2x4xf32> to vector<4x4x2x4xf32>
    %42 = arith.subf %36, %41 : vector<4x4x2x4xf32>
    %43 = arith.mulf %42, %42 : vector<4x4x2x4xf32>
    %cst_24 = arith.constant dense<0.000000e+00> : vector<4x2x4xf32>
    %44 = vector.multi_reduction <add>, %43, %cst_24 [1] : vector<4x4x2x4xf32> to vector<4x2x4xf32>
    %45 = vector.shape_cast %44 : vector<4x2x4xf32> to vector<4x1x2x4xf32>
    %cst_25 = arith.constant 4.000000e+00 : f32
    %46 = vector.broadcast %cst_25 : f32 to vector<4x1x2x4xf32>
    %47 = arith.divf %45, %46 : vector<4x1x2x4xf32>
    %cst_26 = arith.constant 9.99999974E-6 : f32
    %48 = vector.broadcast %cst_26 : f32 to vector<4x1x2x4xf32>
    %49 = arith.addf %47, %48 : vector<4x1x2x4xf32>
    %50 = math.rsqrt %49 : vector<4x1x2x4xf32>
    %51 = vector.broadcast %50 : vector<4x1x2x4xf32> to vector<4x4x2x4xf32>
    %52 = arith.mulf %42, %51 : vector<4x4x2x4xf32>
    %53 = vector.broadcast %0 : vector<1x4x1x1xf32> to vector<4x4x2x4xf32>
    %54 = arith.mulf %52, %53 : vector<4x4x2x4xf32>
    %55 = vector.broadcast %1 : vector<1x4x1x1xf32> to vector<4x4x2x4xf32>
    %56 = arith.addf %54, %55 : vector<4x4x2x4xf32>
    %57 = arith.mulf %56, %56 : vector<4x4x2x4xf32>
    %58 = arith.mulf %56, %57 : vector<4x4x2x4xf32>
    %cst_27 = arith.constant 4.471500e-02 : f32
    %59 = vector.broadcast %cst_27 : f32 to vector<4x4x2x4xf32>
    %60 = arith.mulf %59, %58 : vector<4x4x2x4xf32>
    %61 = arith.addf %56, %60 : vector<4x4x2x4xf32>
    %cst_28 = arith.constant 0.797884583 : f32
    %62 = vector.broadcast %cst_28 : f32 to vector<4x4x2x4xf32>
    %63 = arith.mulf %62, %61 : vector<4x4x2x4xf32>
    %64 = math.tanh %63 : vector<4x4x2x4xf32>
    %cst_29 = arith.constant 1.000000e+00 : f32
    %65 = vector.broadcast %cst_29 : f32 to vector<4x4x2x4xf32>
    %66 = arith.addf %65, %64 : vector<4x4x2x4xf32>
    %cst_30 = arith.constant 5.000000e-01 : f32
    %67 = vector.broadcast %cst_30 : f32 to vector<4x4x2x4xf32>
    %68 = arith.mulf %67, %66 : vector<4x4x2x4xf32>
    %69 = arith.mulf %56, %68 : vector<4x4x2x4xf32>
    %cst_31 = arith.constant 0.000000e+00 : f32
    %70 = vector.broadcast %cst_31 : f32 to vector<4x1x4xf32>
    %71 = vector.extract_strided_slice %35 {offsets = [0, 0, 0, 0], sizes = [1, 4, 2, 4], strides = [1, 1, 1, 1]} : vector<4x4x2x4xf32> to vector<1x4x2x4xf32>
    %72 = vector.shape_cast %71 : vector<1x4x2x4xf32> to vector<4x2x4xf32>
    %c0_32 = arith.constant 0 : index
    %c0_33 = arith.constant 0 : index
    %c4 = arith.constant 4 : index
    %73 = vector.load %arg7[%c0_32, %c0_33, %c4] : memref<4x8x12xf32, #tpu.memory_space<vmem>>, vector<4x2x4xf32>
    tpu.vector_store %arg7[%c0_32, %c0_33, %c4], %72 {strides = array<i32>} : memref<4x8x12xf32, #tpu.memory_space<vmem>>, vector<4x2x4xf32>,
    %74 = vector.extract_strided_slice %69 {offsets = [0, 0, 0, 0], sizes = [1, 4, 2, 4], strides = [1, 1, 1, 1]} : vector<4x4x2x4xf32> to vector<1x4x2x4xf32>
    %75 = vector.shape_cast %74 : vector<1x4x2x4xf32> to vector<4x2x4xf32>
    %c0_34 = arith.constant 0 : index
    %c0_35 = arith.constant 0 : index
    %c8 = arith.constant 8 : index
    %76 = vector.load %arg7[%c0_34, %c0_35, %c8] : memref<4x8x12xf32, #tpu.memory_space<vmem>>, vector<4x2x4xf32>
    tpu.vector_store %arg7[%c0_34, %c0_35, %c8], %75 {strides = array<i32>} : memref<4x8x12xf32, #tpu.memory_space<vmem>>, vector<4x2x4xf32>,
    %c0_36 = arith.constant 0 : index
    %c0_37 = arith.constant 0 : index
    %c0_38 = arith.constant 0 : index
    %77 = vector.load %arg7[%c0_36, %c0_37, %c0_38] : memref<4x8x12xf32, #tpu.memory_space<vmem>>, vector<4x1x4xf32>
    tpu.vector_store %arg7[%c0_36, %c0_37, %c0_38], %70 {strides = array<i32>} : memref<4x8x12xf32, #tpu.memory_space<vmem>>, vector<4x1x4xf32>,
    %78 = vector.extract_strided_slice %69 {offsets = [0, 0, 0, 0], sizes = [1, 4, 2, 4], strides = [1, 1, 1, 1]} : vector<4x4x2x4xf32> to vector<1x4x2x4xf32>
    %79 = vector.shape_cast %78 : vector<1x4x2x4xf32> to vector<4x2x4xf32>
    %80 = vector.extract_strided_slice %79 {offsets = [0, 0, 0], sizes = [4, 1, 4], strides = [1, 1, 1]} : vector<4x2x4xf32> to vector<4x1x4xf32>
    %c0_39 = arith.constant 0 : index
    %c1_40 = arith.constant 1 : index
    %c0_41 = arith.constant 0 : index
    %81 = vector.load %arg7[%c0_39, %c1_40, %c0_41] : memref<4x8x12xf32, #tpu.memory_space<vmem>>, vector<4x1x4xf32>
    tpu.vector_store %arg7[%c0_39, %c1_40, %c0_41], %80 {strides = array<i32>} : memref<4x8x12xf32, #tpu.memory_space<vmem>>, vector<4x1x4xf32>,
    %82 = vector.extract_strided_slice %35 {offsets = [1, 0, 0, 0], sizes = [1, 4, 2, 4], strides = [1, 1, 1, 1]} : vector<4x4x2x4xf32> to vector<1x4x2x4xf32>
    %83 = vector.shape_cast %82 : vector<1x4x2x4xf32> to vector<4x2x4xf32>
    %c0_42 = arith.constant 0 : index
    %c2 = arith.constant 2 : index
    %c4_43 = arith.constant 4 : index
    %84 = vector.load %arg7[%c0_42, %c2, %c4_43] : memref<4x8x12xf32, #tpu.memory_space<vmem>>, vector<4x2x4xf32>
    tpu.vector_store %arg7[%c0_42, %c2, %c4_43], %83 {strides = array<i32>} : memref<4x8x12xf32, #tpu.memory_space<vmem>>, vector<4x2x4xf32>,
    %85 = vector.extract_strided_slice %69 {offsets = [1, 0, 0, 0], sizes = [1, 4, 2, 4], strides = [1, 1, 1, 1]} : vector<4x4x2x4xf32> to vector<1x4x2x4xf32>
    %86 = vector.shape_cast %85 : vector<1x4x2x4xf32> to vector<4x2x4xf32>
    %c0_44 = arith.constant 0 : index
    %c2_45 = arith.constant 2 : index
    %c8_46 = arith.constant 8 : index
    %87 = vector.load %arg7[%c0_44, %c2_45, %c8_46] : memref<4x8x12xf32, #tpu.memory_space<vmem>>, vector<4x2x4xf32>
    tpu.vector_store %arg7[%c0_44, %c2_45, %c8_46], %86 {strides = array<i32>} : memref<4x8x12xf32, #tpu.memory_space<vmem>>, vector<4x2x4xf32>,
    %c0_47 = arith.constant 0 : index
    %c2_48 = arith.constant 2 : index
    %c0_49 = arith.constant 0 : index
    %88 = vector.load %arg7[%c0_47, %c2_48, %c0_49] : memref<4x8x12xf32, #tpu.memory_space<vmem>>, vector<4x1x4xf32>
    tpu.vector_store %arg7[%c0_47, %c2_48, %c0_49], %70 {strides = array<i32>} : memref<4x8x12xf32, #tpu.memory_space<vmem>>, vector<4x1x4xf32>,
    %89 = vector.extract_strided_slice %69 {offsets = [1, 0, 0, 0], sizes = [1, 4, 2, 4], strides = [1, 1, 1, 1]} : vector<4x4x2x4xf32> to vector<1x4x2x4xf32>
    %90 = vector.shape_cast %89 : vector<1x4x2x4xf32> to vector<4x2x4xf32>
    %91 = vector.extract_strided_slice %90 {offsets = [0, 0, 0], sizes = [4, 1, 4], strides = [1, 1, 1]} : vector<4x2x4xf32> to vector<4x1x4xf32>
    %c0_50 = arith.constant 0 : index
    %c3 = arith.constant 3 : index
    %c0_51 = arith.constant 0 : index
    %92 = vector.load %arg7[%c0_50, %c3, %c0_51] : memref<4x8x12xf32, #tpu.memory_space<vmem>>, vector<4x1x4xf32>
    tpu.vector_store %arg7[%c0_50, %c3, %c0_51], %91 {strides = array<i32>} : memref<4x8x12xf32, #tpu.memory_space<vmem>>, vector<4x1x4xf32>,
    %93 = vector.extract_strided_slice %35 {offsets = [2, 0, 0, 0], sizes = [1, 4, 2, 4], strides = [1, 1, 1, 1]} : vector<4x4x2x4xf32> to vector<1x4x2x4xf32>
    %94 = vector.shape_cast %93 : vector<1x4x2x4xf32> to vector<4x2x4xf32>
    %c0_52 = arith.constant 0 : index
    %c4_53 = arith.constant 4 : index
    %c4_54 = arith.constant 4 : index
    %95 = vector.load %arg7[%c0_52, %c4_53, %c4_54] : memref<4x8x12xf32, #tpu.memory_space<vmem>>, vector<4x2x4xf32>
    tpu.vector_store %arg7[%c0_52, %c4_53, %c4_54], %94 {strides = array<i32>} : memref<4x8x12xf32, #tpu.memory_space<vmem>>, vector<4x2x4xf32>,
    %96 = vector.extract_strided_slice %69 {offsets = [2, 0, 0, 0], sizes = [1, 4, 2, 4], strides = [1, 1, 1, 1]} : vector<4x4x2x4xf32> to vector<1x4x2x4xf32>
    %97 = vector.shape_cast %96 : vector<1x4x2x4xf32> to vector<4x2x4xf32>
    %c0_55 = arith.constant 0 : index
    %c4_56 = arith.constant 4 : index
    %c8_57 = arith.constant 8 : index
    %98 = vector.load %arg7[%c0_55, %c4_56, %c8_57] : memref<4x8x12xf32, #tpu.memory_space<vmem>>, vector<4x2x4xf32>
    tpu.vector_store %arg7[%c0_55, %c4_56, %c8_57], %97 {strides = array<i32>} : memref<4x8x12xf32, #tpu.memory_space<vmem>>, vector<4x2x4xf32>,
    %c0_58 = arith.constant 0 : index
    %c4_59 = arith.constant 4 : index
    %c0_60 = arith.constant 0 : index
    %99 = vector.load %arg7[%c0_58, %c4_59, %c0_60] : memref<4x8x12xf32, #tpu.memory_space<vmem>>, vector<4x1x4xf32>
    tpu.vector_store %arg7[%c0_58, %c4_59, %c0_60], %70 {strides = array<i32>} : memref<4x8x12xf32, #tpu.memory_space<vmem>>, vector<4x1x4xf32>,
    %100 = vector.extract_strided_slice %69 {offsets = [2, 0, 0, 0], sizes = [1, 4, 2, 4], strides = [1, 1, 1, 1]} : vector<4x4x2x4xf32> to vector<1x4x2x4xf32>
    %101 = vector.shape_cast %100 : vector<1x4x2x4xf32> to vector<4x2x4xf32>
    %102 = vector.extract_strided_slice %101 {offsets = [0, 0, 0], sizes = [4, 1, 4], strides = [1, 1, 1]} : vector<4x2x4xf32> to vector<4x1x4xf32>
    %c0_61 = arith.constant 0 : index
    %c5 = arith.constant 5 : index
    %c0_62 = arith.constant 0 : index
    %103 = vector.load %arg7[%c0_61, %c5, %c0_62] : memref<4x8x12xf32, #tpu.memory_space<vmem>>, vector<4x1x4xf32>
    tpu.vector_store %arg7[%c0_61, %c5, %c0_62], %102 {strides = array<i32>} : memref<4x8x12xf32, #tpu.memory_space<vmem>>, vector<4x1x4xf32>,
    %104 = vector.extract_strided_slice %35 {offsets = [3, 0, 0, 0], sizes = [1, 4, 2, 4], strides = [1, 1, 1, 1]} : vector<4x4x2x4xf32> to vector<1x4x2x4xf32>
    %105 = vector.shape_cast %104 : vector<1x4x2x4xf32> to vector<4x2x4xf32>
    %c0_63 = arith.constant 0 : index
    %c6 = arith.constant 6 : index
    %c4_64 = arith.constant 4 : index
    %106 = vector.load %arg7[%c0_63, %c6, %c4_64] : memref<4x8x12xf32, #tpu.memory_space<vmem>>, vector<4x2x4xf32>
    tpu.vector_store %arg7[%c0_63, %c6, %c4_64], %105 {strides = array<i32>} : memref<4x8x12xf32, #tpu.memory_space<vmem>>, vector<4x2x4xf32>,
    %107 = vector.extract_strided_slice %69 {offsets = [3, 0, 0, 0], sizes = [1, 4, 2, 4], strides = [1, 1, 1, 1]} : vector<4x4x2x4xf32> to vector<1x4x2x4xf32>
    %108 = vector.shape_cast %107 : vector<1x4x2x4xf32> to vector<4x2x4xf32>
    %c0_65 = arith.constant 0 : index
    %c6_66 = arith.constant 6 : index
    %c8_67 = arith.constant 8 : index
    %109 = vector.load %arg7[%c0_65, %c6_66, %c8_67] : memref<4x8x12xf32, #tpu.memory_space<vmem>>, vector<4x2x4xf32>
    tpu.vector_store %arg7[%c0_65, %c6_66, %c8_67], %108 {strides = array<i32>} : memref<4x8x12xf32, #tpu.memory_space<vmem>>, vector<4x2x4xf32>,
    %c0_68 = arith.constant 0 : index
    %c6_69 = arith.constant 6 : index
    %c0_70 = arith.constant 0 : index
    %110 = vector.load %arg7[%c0_68, %c6_69, %c0_70] : memref<4x8x12xf32, #tpu.memory_space<vmem>>, vector<4x1x4xf32>
    tpu.vector_store %arg7[%c0_68, %c6_69, %c0_70], %70 {strides = array<i32>} : memref<4x8x12xf32, #tpu.memory_space<vmem>>, vector<4x1x4xf32>,
    %111 = vector.extract_strided_slice %69 {offsets = [3, 0, 0, 0], sizes = [1, 4, 2, 4], strides = [1, 1, 1, 1]} : vector<4x4x2x4xf32> to vector<1x4x2x4xf32>
    %112 = vector.shape_cast %111 : vector<1x4x2x4xf32> to vector<4x2x4xf32>
    %113 = vector.extract_strided_slice %112 {offsets = [0, 0, 0], sizes = [4, 1, 4], strides = [1, 1, 1]} : vector<4x2x4xf32> to vector<4x1x4xf32>
    %c0_71 = arith.constant 0 : index
    %c7 = arith.constant 7 : index
    %c0_72 = arith.constant 0 : index
    %114 = vector.load %arg7[%c0_71, %c7, %c0_72] : memref<4x8x12xf32, #tpu.memory_space<vmem>>, vector<4x1x4xf32>
    tpu.vector_store %arg7[%c0_71, %c7, %c0_72], %113 {strides = array<i32>} : memref<4x8x12xf32, #tpu.memory_space<vmem>>, vector<4x1x4xf32>,
    %c0_73 = arith.constant 0 : index
    %c0_74 = arith.constant 0 : index
    %c0_75 = arith.constant 0 : index
    %115 = vector.load %arg7[%c0_73, %c0_74, %c0_75] : memref<4x8x12xf32, #tpu.memory_space<vmem>>, vector<4x8x12xf32>
    %116 = arith.truncf %115 : vector<4x8x12xf32> to vector<4x8x12xbf16>
    %c0_76 = arith.constant 0 : index
    %c0_77 = arith.constant 0 : index
    %c0_78 = arith.constant 0 : index
    %117 = vector.load %arg4[%c0_76, %c0_77, %c0_78] : memref<4x12x4xbf16, #tpu.memory_space<vmem>>, vector<4x12x4xbf16>
    %cst_79 = arith.constant dense<0.000000e+00> : vector<4x8x4xf32>
    %118 = tpu.matmul %116, %117, %cst_79 {dimension_numbers = #tpu.dot_dimension_numbers<[2], [1], [1], [2], [0, 0, 0, 1, 1, 2], [0], [0]>} : vector<4x8x12xbf16>, vector<4x12x4xbf16>, vector<4x8x4xf32> -> vector<4x8x4xf32>
    %c0_80 = arith.constant 0 : index
    %c0_81 = arith.constant 0 : index
    %c0_82 = arith.constant 0 : index
    %119 = vector.load %arg5[%c0_80, %c0_81, %c0_82] : memref<4x1x4xf32, #tpu.memory_space<vmem>>, vector<4x1x4xf32>
    %120 = vector.broadcast %119 : vector<4x1x4xf32> to vector<4x8x4xf32>
    %121 = arith.addf %118, %120 : vector<4x8x4xf32>
    %c0_83 = arith.constant 0 : index
    %c0_84 = arith.constant 0 : index
    %c0_85 = arith.constant 0 : index
    %122 = vector.load %arg6[%c0_83, %c0_84, %c0_85] : memref<4x8x4xf32, #tpu.memory_space<vmem>>, vector<4x8x4xf32>
    tpu.vector_store %arg6[%c0_83, %c0_84, %c0_85], %121 {strides = array<i32>} : memref<4x8x4xf32, #tpu.memory_space<vmem>>, vector<4x8x4xf32>,
    return
  }
  func.func @transform_0(%arg0: i32) -> (i32, i32, i32, i32) {
    %c0_i32 = arith.constant 0 : i32
    %c0_i32_0 = arith.constant 0 : i32
    %c0_i32_1 = arith.constant 0 : i32
    %c0_i32_2 = arith.constant 0 : i32
    return %arg0, %c0_i32, %c0_i32_0, %c0_i32_1 : i32, i32, i32, i32
  }
  func.func @transform_1(%arg0: i32) -> (i32, i32, i32, i32) {
    %c0_i32 = arith.constant 0 : i32
    %c0_i32_0 = arith.constant 0 : i32
    %c0_i32_1 = arith.constant 0 : i32
    %c0_i32_2 = arith.constant 0 : i32
    %c0_i32_3 = arith.constant 0 : i32
    return %c0_i32, %c0_i32_0, %c0_i32_1, %c0_i32_2 : i32, i32, i32, i32
  }
  func.func @transform_2(%arg0: i32) -> (i32, i32, i32, i32) {
    %c0_i32 = arith.constant 0 : i32
    %c0_i32_0 = arith.constant 0 : i32
    %c0_i32_1 = arith.constant 0 : i32
    %c0_i32_2 = arith.constant 0 : i32
    %c0_i32_3 = arith.constant 0 : i32
    return %c0_i32, %c0_i32_0, %c0_i32_1, %c0_i32_2 : i32, i32, i32, i32
  }
  func.func @transform_3(%arg0: i32) -> (i32, i32, i32) {
    %c0_i32 = arith.constant 0 : i32
    %c0_i32_0 = arith.constant 0 : i32
    %c0_i32_1 = arith.constant 0 : i32
    %c0_i32_2 = arith.constant 0 : i32
    return %c0_i32, %c0_i32_0, %c0_i32_1 : i32, i32, i32
  }
  func.func @transform_4(%arg0: i32) -> (i32, i32, i32) {
    %c0_i32 = arith.constant 0 : i32
    %c0_i32_0 = arith.constant 0 : i32
    %c0_i32_1 = arith.constant 0 : i32
    %c0_i32_2 = arith.constant 0 : i32
    return %c0_i32, %c0_i32_0, %c0_i32_1 : i32, i32, i32
  }
  func.func @transform_5(%arg0: i32) -> (i32, i32, i32) {
    %c0_i32 = arith.constant 0 : i32
    %c0_i32_0 = arith.constant 0 : i32
    %c0_i32_1 = arith.constant 0 : i32
    return %c0_i32, %arg0, %c0_i32_0 : i32, i32, i32
  }
}

</mosaic_0001>

<bundles_post_ra>
// kernel: tpu_custom_call.1
= control target key start
LH: loop header
LB: loop body
LE: loop exit
PB: predicated region body
PF: predicated region fallthrough
CT: control target
= control target key end

     0   :  { %10 = vsyncpa [#allocation4], 0  ;;  %s1317_s21 = smov [#allocation3]   ;;  %s1318_s23 = smov 64   ;;  %s2370_s0 = inlined_call_operand.hbm [shape: f32[4,4,4,4], index: 0, kind: input, shape index: {}]   ;;  %s2371_s1 = inlined_call_operand.vmem [shape: f32[1,4,1,1], index: 1, kind: input, shape index: {}]   ;;  %s2372_s2 = inlined_call_operand.vmem [shape: f32[1,4,1,1], index: 2, kind: input, shape index: {}]   ;;  %s2373_s3 = inlined_call_operand.vmem [shape: bf16[4,12,4], index: 3, kind: input, shape index: {}]   ;;  %s2374_s4 = inlined_call_operand.vmem [shape: f32[4,1,4], index: 4, kind: input, shape index: {}]   ;;  %s2375_s5 = inlined_call_operand.vmem [shape: f32[4,8,4], index: 5, kind: output, shape index: {}]  }
   0x1   :  { %s15_s20 = sshll.u32 %s2370_s0, 4  ;;  %s17_s22 = sshll.u32 %s1317_s21, 4  ;;  %s16_s20 = int_to_ptr.hbm [resolvable:$true] %s15_s20  ;;  %s18_s22 = int_to_ptr.vmem [resolvable:$true] %s17_s22 }
   0x2   :  { %s1319_s24 = smov 4  }
   0x3   :  { %23 = dma.hbm_to_vmem [thread:$0]  %s16_s20, 1024, %s18_s22, [#allocation4], %s1318_s23, %s1318_s23, %s1319_s24  }
   0x4   :  { %1315 = dma.done.wait [#allocation4], 1024  }
   0x5   :  { %1316 = vsyncadd [#allocation4], 4294966272  ;;  %v1320_v0 = vmov 0   ;;  %v1197_v1 = vld [vmem:[%s2372_s2 + $0x2] ss:$0 sm:$0xff]  ;;  %v1321_v9 = vmov 4.0  }
   0x6   :  { %1195 = vset.pattern.permute.xlu1 %v1320_v0  ;;  %1194 = vset.pattern.permute.xlu0 %v1320_v0  ;;  %v1198_v2 = vld [vmem:[%s2371_s1 + $0x2] ss:$0 sm:$0xff]  ;;  %v1203_v3 = vld [vmem:[%s2371_s1] ss:$0 sm:$0xff]  ;;  %v1199_v4 = vld [vmem:[%s2372_s2 + $0x3] ss:$0 sm:$0xff]  ;;  %1209 = vrcp.f32 %v1321_v9 }
   0x7   :  { %1196 = vset.pattern.permute.xlu2 %v1320_v0  ;;  %297 = vperm.xlu1 %1195, %v1197_v1   ;;  %v1200_v5 = vld [vmem:[%s2371_s1 + $0x3] ss:$0 sm:$0xff]  ;;  %v1204_v6 = vld [vmem:[%s2371_s1 + $0x1] ss:$0 sm:$0xff]  ;;  %v1202_v8 = vld [vmem:[%s2372_s2] ss:$0 sm:$0xff] }
   0x8   :  { %257 = vperm.xlu0 %1194, %v1198_v2   ;;  %249 = vperm.xlu2 %1196, %v1203_v3   ;;  %v1201_v7 = vld [vmem:[%s2372_s2 + $0x1] ss:$0 sm:$0xff]  ;;  %v53_v12 = vld [vmem:[#allocation3 + $0x10] ss:$2 sm:$0x3]  ;;  %vm76_vm0 = vcmask 25600  }
   0x9   :  { %v55_v13 = vld [vmem:[#allocation3 + $0x14] ss:$2 sm:$0x3]  ;;  %v45_v15 = vld [vmem:[#allocation3] ss:$2 sm:$0x3] }
   0xa   :  { %v57_v16 = vld [vmem:[#allocation3 + $0x18] ss:$2 sm:$0x3]  ;;  %v84_v17 = vsel %vm76_vm0, %v53_v12, 0.0  ;;  %v85_v18 = vsel %vm76_vm0, %v55_v13, 0.0  ;;  %v77_v23 = vsel %vm76_vm0, %v45_v15, 0.0 }
   0xb   :  { %v86_v19 = vadd.f32 %v85_v18, %v84_v17  ;;  %v87_v20 = vsel %vm76_vm0, %v57_v16, 0.0  ;;  %v47_v22 = vld [vmem:[#allocation3 + $0x4] ss:$2 sm:$0x3]  ;;  %s1322_s1 = smov 8  }
   0xc   :  { %v1210_v10 = vpop.eup %1209  ;;  %v59_v24 = vld [vmem:[#allocation3 + $0x1c] ss:$2 sm:$0x3]  ;;  %v49_v25 = vld [vmem:[#allocation3 + $0x8] ss:$2 sm:$0x3] }
   0xd   :  { %v106_v11 = vmul.f32 4.0, %v1210_v10  ;;  %v88_v26 = vadd.f32 %v87_v20, %v86_v19  ;;  %v89_v27 = vsel %vm76_vm0, %v59_v24, 0.0  ;;  %v51_v29 = vld [vmem:[#allocation3 + $0xc] ss:$2 sm:$0x3]  ;;  %v78_v30 = vsel %vm76_vm0, %v47_v22, 0.0 }
   0xe   :  { %vm110_vm1 = vweird.f32 %v1210_v10  ;;  %v79_v31 = vadd.f32 %v78_v30, %v77_v23  ;;  %v80_v32 = vsel %vm76_vm0, %v49_v25, 0.0  ;;  %v82_v33 = vsel %vm76_vm0, %v51_v29, 0.0  ;;  %v61_v34 = vld [vmem:[#allocation3 + $0x20] ss:$2 sm:$0x3] }
   0xf   :  { %301 = vperm.xlu1 %1195, %v1199_v4   ;;  %v107_v14 = vsub.f32 1.0, %v106_v11  ;;  %v90_v35 = vadd.f32 %v89_v27, %v88_v26  ;;  %v63_v37 = vld [vmem:[#allocation3 + $0x24] ss:$2 sm:$0x3]  ;;  %v91_v41 = vsel %vm76_vm0, %v61_v34, 0.0 }
  0x10   :  { %261 = vperm.xlu0 %1194, %v1200_v5   ;;  %253 = vperm.xlu2 %1196, %v1204_v6   ;;  %v65_v38 = vld [vmem:[#allocation3 + $0x28] ss:$2 sm:$0x3]  ;;  %v81_v39 = vadd.f32 %v80_v32, %v79_v31  ;;  %v67_v40 = vld [vmem:[#allocation3 + $0x2c] ss:$2 sm:$0x3] }
  0x11   :  { %v108_v21 = vmul.f32 %v1210_v10, %v107_v14  ;;  %v92_v42 = vsel %vm76_vm0, %v63_v37, 0.0  ;;  %v94_v43 = vsel %vm76_vm0, %v65_v38, 0.0  ;;  %v96_v46 = vsel %vm76_vm0, %v67_v40, 0.0  ;;  %v1397_v47 = vld [vmem:[#allocation3 + $0x1] ss:$2 sm:$0x3] }
  0x12   :  { %v93_v45 = vadd.f32 %v92_v42, %v91_v41  ;;  %v83_v48 = vadd.f32 %v82_v33, %v81_v39  ;;  %v1399_v49 = vld [vmem:[#allocation3 + $0x5] ss:$2 sm:$0x3]  ;;  %v1401_v50 = vld [vmem:[#allocation3 + $0x9] ss:$2 sm:$0x3] }
  0x13   :  { %v109_v28 = vadd.f32 %v1210_v10, %v108_v21  ;;  %v496_v54 = vsel %vm76_vm0, %v1397_v47, 0.0  ;;  %v497_v57 = vsel %vm76_vm0, %v1399_v49, 0.0  ;;  %v499_v58 = vsel %vm76_vm0, %v1401_v50, 0.0  ;;  %v1448_v20 = vld [vmem:[#allocation3 + $0x30] ss:$2 sm:$0x3] }
  0x14   :  { %v95_v53 = vadd.f32 %v94_v43, %v93_v45  ;;  %v498_v62 = vadd.f32 %v497_v57, %v496_v54  ;;  %v98_v33 = vsel %vm76_vm0, %v1448_v20, 0.0  ;;  %v73_v39 = vld [vmem:[#allocation3 + $0x38] ss:$2 sm:$0x3] }
  0x15   :  { %v1390_v36 = vsel %vm110_vm1, %v1210_v10, %v109_v28  ;;  %v75_v43 = vld [vmem:[#allocation3 + $0x3c] ss:$2 sm:$0x3] }
  0x16   :  { %v113_v44 = vmul.f32 %v1390_v36, %v90_v35  ;;  %v112_v56 = vmul.f32 %v1390_v36, %v83_v48  ;;  %v97_v61 = vadd.f32 %v96_v46, %v95_v53  ;;  %v500_v19 = vadd.f32 %v499_v58, %v498_v62 }
  0x17   :  { %293 = vperm.xlu1 %1195, %v1201_v7   ;;  %v103_v62 = vsel %vm76_vm0, %v75_v43, 0.0 }
  0x18   :  { %289 = vperm.xlu0 %1194, %v1202_v8   ;;  %v1403_v51 = vsub.f32 %v53_v12, %v113_v44  ;;  %v1405_v52 = vsub.f32 %v55_v13, %v113_v44  ;;  %v1409_v55 = vsub.f32 %v57_v16, %v113_v44  ;;  %v1420_v63 = vsub.f32 %v59_v24, %v113_v44 }
  0x19   :  { %v1424_v1 = vsub.f32 %v45_v15, %v112_v56  ;;  %v1426_v2 = vsub.f32 %v47_v22, %v112_v56  ;;  %v1430_v5 = vsub.f32 %v49_v25, %v112_v56  ;;  %v1432_v6 = vsub.f32 %v51_v29, %v112_v56  ;;  %v471_v15 = vld [vmem:[#allocation3 + $0xd] ss:$2 sm:$0x3]  ;;  %v71_v29 = vld [vmem:[#allocation3 + $0x34] ss:$2 sm:$0x3] }
  0x1a   :  { %v136_v59 = vmul.f32 %v1403_v51, %v1403_v51  ;;  %v137_v60 = vmul.f32 %v1405_v52, %v1405_v52  ;;  %v138_v0 = vmul.f32 %v1409_v55, %v1409_v55  ;;  %v139_v7 = vmul.f32 %v1420_v63, %v1420_v63 }
  0x1b   :  { %v132_v10 = vmul.f32 %v1424_v1, %v1424_v1  ;;  %v133_v11 = vmul.f32 %v1426_v2, %v1426_v2  ;;  %v134_v12 = vmul.f32 %v1430_v5, %v1430_v5  ;;  %v135_v13 = vmul.f32 %v1432_v6, %v1432_v6 }
  0x1c   :  { %v155_v3 = vsel %vm76_vm0, %v136_v59, 0.0  ;;  %v156_v4 = vsel %vm76_vm0, %v137_v60, 0.0  ;;  %v158_v9 = vsel %vm76_vm0, %v138_v0, 0.0  ;;  %v114_v14 = vmul.f32 %v1390_v36, %v97_v61  ;;  %v1481_v59 = vld [vmem:[#allocation3 + $0x11] ss:$2 sm:$0x3] }
  0x1d   :  { %v157_v8 = vadd.f32 %v156_v4, %v155_v3  ;;  %v160_v17 = vsel %vm76_vm0, %v139_v7, 0.0  ;;  %v148_v18 = vsel %vm76_vm0, %v132_v10, 0.0  ;;  %v149_v21 = vsel %vm76_vm0, %v133_v11, 0.0 }
  0x1e   :  { %v151_v22 = vsel %vm76_vm0, %v134_v12, 0.0  ;;  %v153_v23 = vsel %vm76_vm0, %v135_v13, 0.0  ;;  %v1453_v24 = vsub.f32 %v61_v34, %v114_v14  ;;  %v150_v26 = vadd.f32 %v149_v21, %v148_v18 }
  0x1f   :  { %v159_v16 = vadd.f32 %v158_v9, %v157_v8  ;;  %v1455_v27 = vsub.f32 %v63_v37, %v114_v14  ;;  %v1457_v28 = vsub.f32 %v65_v38, %v114_v14  ;;  %v1459_v30 = vsub.f32 %v67_v40, %v114_v14  ;;  %v475_v8 = vld [vmem:[#allocation3 + $0x15] ss:$2 sm:$0x3] }
  0x20   :  { %v140_v31 = vmul.f32 %v1453_v24, %v1453_v24  ;;  %v501_v32 = vsel %vm76_vm0, %v471_v15, 0.0  ;;  %v152_v35 = vadd.f32 %v151_v22, %v150_v26  ;;  %v99_v44 = vsel %vm76_vm0, %v71_v29, 0.0 }
  0x21   :  { %v161_v25 = vadd.f32 %v160_v17, %v159_v16  ;;  %v141_v37 = vmul.f32 %v1455_v27, %v1455_v27  ;;  %v142_v38 = vmul.f32 %v1457_v28, %v1457_v28  ;;  %v143_v40 = vmul.f32 %v1459_v30, %v1459_v30  ;;  %v477_v16 = vld [vmem:[#allocation3 + $0x19] ss:$2 sm:$0x3] }
  0x22   :  { %v162_v41 = vsel %vm76_vm0, %v140_v31, 0.0  ;;  %v502_v42 = vadd.f32 %v501_v32, %v500_v19  ;;  %v154_v46 = vadd.f32 %v153_v23, %v152_v35  ;;  %v100_v58 = vadd.f32 %v99_v44, %v98_v33  ;;  %v479_v31 = vld [vmem:[#allocation3 + $0x1d] ss:$2 sm:$0x3] }
  0x23   :  { %v177_v34 = vmul.f32 %v161_v25, %v1390_v36  ;;  %v163_v48 = vsel %vm76_vm0, %v141_v37, 0.0  ;;  %v165_v53 = vsel %vm76_vm0, %v142_v38, 0.0  ;;  %v167_v56 = vsel %vm76_vm0, %v143_v40, 0.0 }
  0x24   :  { %v164_v54 = vadd.f32 %v163_v48, %v162_v41  ;;  %v524_v57 = vmul.f32 %v502_v42, %v1390_v36  ;;  %v176_v60 = vmul.f32 %v154_v46, %v1390_v36  ;;  %v101_v61 = vsel %vm76_vm0, %v73_v39, 0.0 }
  0x25   :  { %v1475_v45 = vadd.f32 1e-05, %v177_v34  ;;  %v102_v11 = vadd.f32 %v101_v61, %v100_v58  ;;  %v503_v12 = vsel %vm76_vm0, %v1481_v59, 0.0  ;;  %v504_v17 = vsel %vm76_vm0, %v475_v8, 0.0 }
  0x26   :  { %v166_v0 = vadd.f32 %v165_v53, %v164_v54  ;;  %v1488_v3 = vsub.f32 %v1397_v47, %v524_v57  ;;  %v1491_v4 = vsub.f32 %v1399_v49, %v524_v57  ;;  %v1494_v7 = vsub.f32 %v1401_v50, %v524_v57 }
  0x27   :  { %1211 = vrsqrt.f32 %v1475_v45  ;;  %v1496_v9 = vadd.f32 1e-05, %v176_v60  ;;  %v1498_v10 = vsub.f32 %v471_v15, %v524_v57  ;;  %v104_v15 = vadd.f32 %v103_v62, %v102_v11 }
  0x28   :  { %2382 = vst [vmem:[#allocation6_spill] sm:$0xff] %v1491_v4  ;;  %v168_v13 = vadd.f32 %v167_v56, %v166_v0  ;;  %v544_v47 = vmul.f32 %v1488_v3, %v1488_v3  ;;  %v545_v49 = vmul.f32 %v1491_v4, %v1491_v4  ;;  %v546_v50 = vmul.f32 %v1494_v7, %v1494_v7 }
  0x29   :  { %1213 = vrsqrt.f32 %v1496_v9  ;;  %v547_v14 = vmul.f32 %v1498_v10, %v1498_v10  ;;  %v115_v26 = vmul.f32 %v1390_v36, %v104_v15  ;;  %v505_v32 = vadd.f32 %v504_v17, %v503_v12 }
  0x2a   :  { %v178_v18 = vmul.f32 %v168_v13, %v1390_v36  ;;  %v560_v19 = vsel %vm76_vm0, %v544_v47, 0.0  ;;  %v561_v21 = vsel %vm76_vm0, %v545_v49, 0.0  ;;  %v563_v22 = vsel %vm76_vm0, %v546_v50, 0.0 }
  0x2b   :  { %v562_v25 = vadd.f32 %v561_v21, %v560_v19  ;;  %v565_v34 = vsel %vm76_vm0, %v547_v14, 0.0  ;;  %v506_v35 = vsel %vm76_vm0, %v477_v16, 0.0  ;;  %v1524_v38 = vsub.f32 %v1448_v20, %v115_v26 }
  0x2c   :  { %v1519_v33 = vadd.f32 1e-05, %v178_v18  ;;  %v1526_v40 = vsub.f32 %v71_v29, %v115_v26  ;;  %v1528_v41 = vsub.f32 %v73_v39, %v115_v26  ;;  %v1530_v42 = vsub.f32 %v75_v43, %v115_v26 }
  0x2d   :  { %v1516_v23 = vpop.eup %1211  ;;  %v564_v37 = vadd.f32 %v563_v22, %v562_v25  ;;  %v507_v44 = vadd.f32 %v506_v35, %v505_v32  ;;  %v508_v46 = vsel %vm76_vm0, %v479_v31, 0.0  ;;  %v144_v54 = vmul.f32 %v1524_v38, %v1524_v38  ;;  %v1570_v25 = vld [vmem:[#allocation3 + $0x31] ss:$2 sm:$0x3] }
  0x2e   :  { %v145_v56 = vmul.f32 %v1526_v40, %v1526_v40  ;;  %v146_v20 = vmul.f32 %v1528_v41, %v1528_v41  ;;  %v195_v29 = vmul.f32 %v1516_v23, %v1475_v45  ;;  %1215 = vrsqrt.f32 %v1519_v33  ;;  %v491_v35 = vld [vmem:[#allocation3 + $0x35] ss:$2 sm:$0x3] }
  0x2f   :  { %v1533_v48 = vpop.eup %1213  ;;  %v566_v53 = vadd.f32 %v565_v34, %v564_v37  ;;  %v147_v39 = vmul.f32 %v1530_v42, %v1530_v42  ;;  %v169_v57 = vsel %vm76_vm0, %v144_v54, 0.0  ;;  %v509_v60 = vadd.f32 %v508_v46, %v507_v44 }
  0x30   :  { %v170_v58 = vsel %vm76_vm0, %v145_v56, 0.0  ;;  %v185_v61 = vmul.f32 %v1533_v48, %v1496_v9  ;;  %v172_v0 = vsel %vm76_vm0, %v146_v20, 0.0  ;;  %v196_v11 = vmul.f32 %v1516_v23, %v195_v29  ;;  %v495_v29 = vld [vmem:[#allocation3 + $0x3d] ss:$2 sm:$0x3] }
  0x31   :  { %v588_v43 = vmul.f32 %v566_v53, %v1390_v36  ;;  %v171_v62 = vadd.f32 %v170_v58, %v169_v57  ;;  %v174_v13 = vsel %vm76_vm0, %v147_v39, 0.0  ;;  %v525_v49 = vmul.f32 %v509_v60, %v1390_v36  ;;  %v1598_v60 = vld [vmem:[#allocation3 + $0x21] ss:$2 sm:$0x3] }
  0x32   :  { %v186_v14 = vmul.f32 %v1533_v48, %v185_v61  ;;  %v197_v18 = vmul.f32 0.5, %v196_v11  ;;  %v517_v53 = vsel %vm76_vm0, %v1570_v25, 0.0  ;;  %vm200_vm2 = vweird.f32 %v1475_v45  ;;  %v1602_v11 = vld [vmem:[#allocation3 + $0x25] ss:$2 sm:$0x3] }
  0x33   :  { %v1553_v12 = vadd.f32 1e-05, %v588_v43  ;;  %v173_v47 = vadd.f32 %v172_v0, %v171_v62  ;;  %v1562_v17 = vsub.f32 %v1481_v59, %v525_v49  ;;  %v1564_v19 = vsub.f32 %v475_v8, %v525_v49 }
  0x34   :  { %v1557_v50 = vpop.eup %1215  ;;  %v1566_v21 = vsub.f32 %v477_v16, %v525_v49  ;;  %v1568_v22 = vsub.f32 %v479_v31, %v525_v49  ;;  %v187_v59 = vmul.f32 0.5, %v186_v14  ;;  %v493_v31 = vld [vmem:[#allocation3 + $0x39] ss:$2 sm:$0x3]  ;;  %v198_v56 = vsub.f32 1.5, %v197_v18 }
  0x35   :  { %1217 = vrsqrt.f32 %v1553_v12  ;;  %v175_v15 = vadd.f32 %v174_v13, %v173_v47  ;;  %2383 = vst [vmem:[#allocation7_spill] sm:$0xff] %v1564_v19  ;;  %v205_v26 = vmul.f32 %v1557_v50, %v1519_v33  ;;  %v548_v34 = vmul.f32 %v1562_v17, %v1562_v17  ;;  %v485_v14 = vld [vmem:[#allocation3 + $0x29] ss:$2 sm:$0x3] }
  0x36   :  { %v549_v8 = vmul.f32 %v1564_v19, %v1564_v19  ;;  %v550_v16 = vmul.f32 %v1566_v21, %v1566_v21  ;;  %v551_v44 = vmul.f32 %v1568_v22, %v1568_v22  ;;  %v518_v39 = vsel %vm76_vm0, %v491_v35, 0.0 }
  0x37   :  { %v179_v32 = vmul.f32 %v175_v15, %v1390_v36  ;;  %v567_v46 = vsel %vm76_vm0, %v548_v34, 0.0  ;;  %v206_v43 = vmul.f32 %v1557_v50, %v205_v26  ;;  %vm201_vm3 = vweird.f32 %v1516_v23 }
  0x38   :  { %v568_v20 = vsel %vm76_vm0, %v549_v8, 0.0  ;;  %v570_v58 = vsel %vm76_vm0, %v550_v16, 0.0  ;;  %v519_v62 = vadd.f32 %v518_v39, %v517_v53  ;;  %v520_v0 = vsel %vm76_vm0, %v493_v31, 0.0  ;;  %vm202_vm6 = vmor %vm200_vm2, %vm201_vm3 }
  0x39   :  { %v1581_v37 = vadd.f32 1e-05, %v179_v32  ;;  %v569_v61 = vadd.f32 %v568_v20, %v567_v46  ;;  %v188_v13 = vsub.f32 1.5, %v187_v59  ;;  %vm190_vm4 = vweird.f32 %v1496_v9  ;;  %v487_v32 = vld [vmem:[#allocation3 + $0x2d] ss:$2 sm:$0x3] }
  0x3a   :  { %v572_v49 = vsel %vm76_vm0, %v551_v44, 0.0  ;;  %v199_v15 = vmul.f32 %v1516_v23, %v198_v56  ;;  %vm191_vm5 = vweird.f32 %v1533_v48  ;;  %v521_v26 = vadd.f32 %v520_v0, %v519_v62 }
  0x3b   :  { %v1588_v54 = vpop.eup %1217  ;;  %1219 = vrsqrt.f32 %v1581_v37  ;;  %v571_v18 = vadd.f32 %v570_v58, %v569_v61  ;;  %v207_v34 = vmul.f32 0.5, %v206_v43  ;;  %v522_v8 = vsel %vm76_vm0, %v495_v29, 0.0  ;;  %vm192_vm8 = vmor %vm190_vm4, %vm191_vm5 }
  0x3c   :  { %v597_v57 = vmul.f32 %v1588_v54, %v1553_v12  ;;  %v510_v59 = vsel %vm76_vm0, %v1598_v60, 0.0  ;;  %v511_v16 = vsel %vm76_vm0, %v1602_v11, 0.0  ;;  %v523_v46 = vadd.f32 %v522_v8, %v521_v26 }
  0x3d   :  { %v573_v44 = vadd.f32 %v572_v49, %v571_v18  ;;  %v512_v53 = vadd.f32 %v511_v16, %v510_v59  ;;  %v513_v56 = vsel %vm76_vm0, %v485_v14, 0.0  ;;  %v189_v39 = vmul.f32 %v1533_v48, %v188_v13 }
  0x3e   :  { %v598_v47 = vmul.f32 %v1588_v54, %v597_v57  ;;  %vm210_vm7 = vweird.f32 %v1519_v33  ;;  %v527_v45 = vmul.f32 %v523_v46, %v1390_v36  ;;  %v515_v61 = vsel %vm76_vm0, %v487_v32, 0.0 }
  0x3f   :  { %v589_v58 = vmul.f32 %v573_v44, %v1390_v36  ;;  %v1629_v62 = vsel %vm202_vm6, %v1516_v23, %v199_v15  ;;  %v208_v0 = vsub.f32 1.5, %v207_v34  ;;  %vm211_vm9 = vweird.f32 %v1557_v50 }
  0x40   :  { %v599_v43 = vmul.f32 0.5, %v598_v47  ;;  %v514_v13 = vadd.f32 %v513_v56, %v512_v53  ;;  %v1640_v18 = vsub.f32 %v1570_v25, %v527_v45  ;;  %v1642_v26 = vsub.f32 %v491_v35, %v527_v45  ;;  %vm1677_vm14 = vmor %vm210_vm7, %vm211_vm9 }
  0x41   :  { %v1619_v20 = vpop.eup %1219  ;;  %v1637_v49 = vadd.f32 1e-05, %v589_v58  ;;  %vm602_vm10 = vweird.f32 %v1553_v12  ;;  %v1645_v23 = vsub.f32 %v493_v31, %v527_v45  ;;  %v1647_v15 = vsub.f32 %v495_v29, %v527_v45 }
  0x42   :  { %v215_v57 = vmul.f32 %v1619_v20, %v1581_v37  ;;  %2384 = vst [vmem:[#allocation8_spill] sm:$0xff] %v1640_v18  ;;  %v516_v9 = vadd.f32 %v515_v61, %v514_v13  ;;  %v1650_v34 = vsel %vm192_vm8, %v1533_v48, %v189_v39  ;;  %v600_v8 = vsub.f32 1.5, %v599_v43 }
  0x43   :  { %2385 = vst [vmem:[#allocation9_spill] sm:$0xff] %v1642_v26  ;;  %1221 = vrsqrt.f32 %v1637_v49  ;;  %v209_v16 = vmul.f32 %v1557_v50, %v208_v0  ;;  %v556_v25 = vmul.f32 %v1640_v18, %v1640_v18  ;;  %v557_v35 = vmul.f32 %v1642_v26, %v1642_v26 }
  0x44   :  { %v216_v47 = vmul.f32 %v1619_v20, %v215_v57  ;;  %v558_v31 = vmul.f32 %v1645_v23, %v1645_v23  ;;  %vm603_vm11 = vweird.f32 %v1588_v54  ;;  %v559_v48 = vmul.f32 %v1647_v15, %v1647_v15 }
  0x45   :  { %v526_v44 = vmul.f32 %v516_v9, %v1390_v36  ;;  %vm220_vm12 = vweird.f32 %v1581_v37  ;;  %v581_v46 = vsel %vm76_vm0, %v556_v25, 0.0  ;;  %v582_v53 = vsel %vm76_vm0, %v557_v35, 0.0  ;;  %vm604_vm15 = vmor %vm602_vm10, %vm603_vm11 }
  0x46   :  { %v217_v59 = vmul.f32 0.5, %v216_v47  ;;  %v584_v56 = vsel %vm76_vm0, %v558_v31, 0.0  ;;  %v601_v39 = vmul.f32 %v1588_v54, %v600_v8  ;;  %vm221_vm13 = vweird.f32 %v1619_v20 }
  0x47   :  { %v583_v43 = vadd.f32 %v582_v53, %v581_v46  ;;  %v1671_v57 = vsub.f32 %v1598_v60, %v526_v44  ;;  %v586_v45 = vsel %vm76_vm0, %v559_v48, 0.0  ;;  %v1683_v61 = vsub.f32 %v1602_v11, %v526_v44  ;;  %vm222_vm1 = vmor %vm220_vm12, %vm221_vm13 }
  0x48   :  { %v218_v29 = vsub.f32 1.5, %v217_v59  ;;  %v1685_v0 = vsub.f32 %v485_v14, %v526_v44  ;;  %v1687_v13 = vsub.f32 %v487_v32, %v526_v44  ;;  %v230_v11 = vmul.f32 %v1629_v62, %v1409_v55 }
  0x49   :  { %2386 = vst [vmem:[#allocation10_spill] sm:$0xff] %v1671_v57  ;;  %v1222_v47 = vpop.eup %1221  ;;  %v585_v60 = vadd.f32 %v584_v56, %v583_v43  ;;  %v552_v9 = vmul.f32 %v1671_v57, %v1671_v57  ;;  %v226_v14 = vmul.f32 %v1650_v34, %v1430_v5  ;;  %v553_v8 = vmul.f32 %v1683_v61, %v1683_v61 }
  0x4a   :  { %2389 = vst [vmem:[#allocation11_spill] sm:$0xff] %v1683_v61  ;;  %v219_v33 = vmul.f32 %v1619_v20, %v218_v29  ;;  %v607_v12 = vmul.f32 %v1222_v47, %v1637_v49  ;;  %v554_v59 = vmul.f32 %v1685_v0, %v1685_v0  ;;  %v555_v55 = vmul.f32 %v1687_v13, %v1687_v13 }
  0x4b   :  { %v587_v32 = vadd.f32 %v586_v45, %v585_v60  ;;  %v1714_v5 = vsel %vm1677_vm14, %v1557_v50, %v209_v16  ;;  %v1717_v37 = vsel %vm604_vm15, %v1588_v54, %v601_v39  ;;  %v574_v35 = vsel %vm76_vm0, %v552_v9, 0.0 }
  0x4c   :  { %v608_v25 = vmul.f32 %v1222_v47, %v607_v12  ;;  %v1721_v31 = vsel %vm222_vm1, %v1619_v20, %v219_v33  ;;  %v575_v48 = vsel %vm76_vm0, %v553_v8, 0.0  ;;  %v577_v44 = vsel %vm76_vm0, %v554_v59, 0.0 }
  0x4d   :  { %v591_v29 = vmul.f32 %v587_v32, %v1390_v36  ;;  %vm612_vm2 = vweird.f32 %v1637_v49  ;;  %vm613_vm3 = vweird.f32 %v1222_v47  ;;  %v576_v50 = vadd.f32 %v575_v48, %v574_v35 }
  0x4e   :  { %v609_v46 = vmul.f32 0.5, %v608_v25  ;;  %v638_v54 = vmul.f32 %v1717_v37, %v1494_v7  ;;  %v234_v16 = vmul.f32 %v1714_v5, %v1457_v28  ;;  %v579_v20 = vsel %vm76_vm0, %v555_v55, 0.0  ;;  %vm614_vm4 = vmor %vm612_vm2, %vm613_vm3 }
  0x4f   :  { %v1731_v53 = vadd.f32 1e-05, %v591_v29  ;;  %v238_v56 = vmul.f32 %v1721_v31, %v1528_v41  ;;  %v578_v43 = vadd.f32 %v577_v44, %v576_v50  ;;  %v227_v49 = vmul.f32 %v1650_v34, %v1432_v6 }
  0x50   :  { %v610_v39 = vsub.f32 1.5, %v609_v46  ;;  %v235_v28 = vmul.f32 %v1714_v5, %v1459_v30  ;;  %v231_v45 = vmul.f32 %v1629_v62, %v1420_v63  ;;  %v639_v30 = vmul.f32 %v1717_v37, %v1498_v10 }
  0x51   :  { %1223 = vrsqrt.f32 %v1731_v53  ;;  %v580_v41 = vadd.f32 %v579_v20, %v578_v43  ;;  %v239_v10 = vmul.f32 %v1721_v31, %v1530_v42  ;;  %vm632_vm0 = vweird.f32 %v1731_v53 }
  0x52   :  { %v611_v33 = vmul.f32 %v1222_v47, %v610_v39  ;;  %vm844_vm10 = vcmask 58400   ;;  %vm865_vm11 = vcmask 91200   ;;  %vm870_vm12 = vcmask 24576  }
  0x53   :  { %v590_v59 = vmul.f32 %v580_v41, %v1390_v36  ;;  %vm1064_vm13 = vcmask 1045504   ;;  %vm1060_vm14 = vcmask 97280   ;;  %vm1153_vm15 = vcmask 31744  }
  0x54   :  { %v1752_v8 = vsel %vm614_vm4, %v1222_v47, %v611_v33 }
  0x55   :  { %v642_v36 = vmul.f32 %v1752_v8, %v1566_v21  ;;  %v1776_v25 = vadd.f32 1e-05, %v590_v59  ;;  %v643_v21 = vmul.f32 %v1752_v8, %v1568_v22 }
  0x57   :  { %v1778_v35 = vpop.eup %1223  ;;  %1225 = vrsqrt.f32 %v1776_v25  ;;  %vm622_vm7 = vweird.f32 %v1776_v25 }
  0x58   :  { %vm633_vm5 = vweird.f32 %v1778_v35 }
  0x59   :  { %vm634_vm6 = vmor %vm632_vm0, %vm633_vm5 }
  0x79   :  { %v1739_v58 = vpop.permute.xlu1 %297 }
  0x7a   :  { %v1741_v7 = vpop.permute.xlu0 %257 }
  0x7b   :  { %v270_v60 = vmul.f32 %v1741_v7, %v230_v11  ;;  %v266_v9 = vmul.f32 %v1741_v7, %v226_v14  ;;  %v654_v6 = vmul.f32 %v638_v54, %v1741_v7  ;;  %v274_v12 = vmul.f32 %v1741_v7, %v234_v16 }
  0x7c   :  { %v278_v32 = vmul.f32 %v1741_v7, %v238_v56  ;;  %v658_v50 = vmul.f32 %v642_v36, %v1741_v7  ;;  %v627_v54 = vmul.f32 %v1778_v35, %v1731_v53 }
  0x7d   :  { %v1758_v63 = vadd.f32 %v1739_v58, %v270_v60  ;;  %v1761_v11 = vadd.f32 %v1739_v58, %v266_v9  ;;  %v1764_v14 = vadd.f32 %v654_v6, %v1739_v58  ;;  %v1767_v55 = vadd.f32 %v1739_v58, %v274_v12 }
  0x7e   :  { %v1770_v47 = vadd.f32 %v1739_v58, %v278_v32  ;;  %v1803_v41 = vadd.f32 %v658_v50, %v1739_v58  ;;  %v628_v22 = vmul.f32 %v1778_v35, %v627_v54 }
  0x7f   :  { %v326_v29 = vmul.f32 %v1758_v63, %v1758_v63  ;;  %v322_v48 = vmul.f32 %v1761_v11, %v1761_v11  ;;  %v686_v44 = vmul.f32 %v1764_v14, %v1764_v14  ;;  %v330_v46 = vmul.f32 %v1767_v55, %v1767_v55 }
  0x80   :  { %v334_v42 = vmul.f32 %v1770_v47, %v1770_v47 }
  0x81   :  { %v342_v16 = vmul.f32 %v326_v29, %v1758_v63  ;;  %v338_v20 = vmul.f32 %v322_v48, %v1761_v11  ;;  %v702_v56 = vmul.f32 %v686_v44, %v1764_v14  ;;  %v346_v39 = vmul.f32 %v330_v46, %v1767_v55  ;;  %v1809_v32 = vpop.permute.xlu1 %301 }
  0x82   :  { %v1799_v43 = vpop.permute.xlu0 %261  ;;  %v350_v33 = vmul.f32 %v334_v42, %v1770_v47 }
  0x83   :  { %v358_v60 = vmul.f32 0.044715, %v342_v16  ;;  %v354_v9 = vmul.f32 0.044715, %v338_v20  ;;  %v275_v6 = vmul.f32 %v1799_v43, %v235_v28  ;;  %v267_v12 = vmul.f32 %v1799_v43, %v227_v49 }
  0x84   :  { %v271_v59 = vmul.f32 %v1799_v43, %v231_v45  ;;  %v718_v36 = vmul.f32 0.044715, %v702_v56  ;;  %v362_v29 = vmul.f32 0.044715, %v346_v39  ;;  %v366_v48 = vmul.f32 0.044715, %v350_v33  ;;  %v1830_v33 = vpop.eup %1225 }
  0x85   :  { %v374_v44 = vadd.f32 %v358_v60, %v1758_v63  ;;  %v370_v46 = vadd.f32 %v354_v9, %v1761_v11  ;;  %v1815_v42 = vadd.f32 %v1809_v32, %v275_v6  ;;  %v1818_v50 = vadd.f32 %v1809_v32, %v267_v12 }
  0x86   :  { %v1821_v28 = vadd.f32 %v1809_v32, %v271_v59  ;;  %v734_v49 = vadd.f32 %v718_v36, %v1764_v14  ;;  %v378_v45 = vadd.f32 %v362_v29, %v1767_v55  ;;  %v382_v54 = vadd.f32 %v366_v48, %v1770_v47 }
  0x87   :  { %v390_v16 = vmul.f32 0.7978846, %v374_v44  ;;  %v386_v20 = vmul.f32 0.7978846, %v370_v46  ;;  %v331_v56 = vmul.f32 %v1815_v42, %v1815_v42  ;;  %v323_v39 = vmul.f32 %v1818_v50, %v1818_v50 }
  0x88   :  { %v327_v60 = vmul.f32 %v1821_v28, %v1821_v28  ;;  %v750_v9 = vmul.f32 0.7978846, %v734_v49  ;;  %v394_v6 = vmul.f32 0.7978846, %v378_v45  ;;  %v398_v12 = vmul.f32 0.7978846, %v382_v54 }
  0x89   :  { %1227 = vtanh.f32 %v390_v16  ;;  %v347_v59 = vmul.f32 %v331_v56, %v1815_v42  ;;  %v339_v36 = vmul.f32 %v323_v39, %v1818_v50  ;;  %v279_v29 = vmul.f32 %v1799_v43, %v239_v10 }
  0x8a   :  { %1229 = vtanh.f32 %v386_v20  ;;  %v343_v48 = vmul.f32 %v327_v60, %v1821_v28  ;;  %v659_v44 = vmul.f32 %v643_v21, %v1799_v43  ;;  %v655_v46 = vmul.f32 %v639_v30, %v1799_v43 }
  0x8b   :  { %v363_v26 = vmul.f32 0.044715, %v347_v59  ;;  %v355_v57 = vmul.f32 0.044715, %v339_v36  ;;  %1231 = vtanh.f32 %v750_v9  ;;  %v1841_v49 = vadd.f32 %v1809_v32, %v279_v29 }
  0x8c   :  { %v359_v45 = vmul.f32 0.044715, %v343_v48  ;;  %1233 = vtanh.f32 %v394_v6  ;;  %v1844_v54 = vadd.f32 %v659_v44, %v1809_v32  ;;  %v1847_v10 = vadd.f32 %v655_v46, %v1809_v32 }
  0x8d   :  { %v379_v16 = vadd.f32 %v363_v26, %v1815_v42  ;;  %v371_v21 = vadd.f32 %v355_v57, %v1818_v50  ;;  %1235 = vtanh.f32 %v398_v12  ;;  %v335_v30 = vmul.f32 %v1841_v49, %v1841_v49 }
  0x8e   :  { %v375_v20 = vadd.f32 %v359_v45, %v1821_v28  ;;  %v691_v56 = vmul.f32 %v1844_v54, %v1844_v54  ;;  %v687_v39 = vmul.f32 %v1847_v10, %v1847_v10  ;;  %v690_v26 = vmul.f32 %v1803_v41, %v1803_v41 }
  0x8f   :  { %v1228_v57 = vpop.eup %1227  ;;  %v395_v60 = vmul.f32 0.7978846, %v379_v16  ;;  %v387_v9 = vmul.f32 0.7978846, %v371_v21  ;;  %v351_v6 = vmul.f32 %v335_v30, %v1841_v49  ;;  %v629_v12 = vmul.f32 0.5, %v628_v22  ;;  %v1866_v22 = vpop.permute.xlu2 %249 }
  0x90   :  { %v1230_v59 = vpop.eup %1229  ;;  %v422_v36 = vadd.f32 1.0, %v1228_v57  ;;  %v391_v29 = vmul.f32 0.7978846, %v375_v20  ;;  %v707_v48 = vmul.f32 %v691_v56, %v1844_v54  ;;  %v703_v44 = vmul.f32 %v687_v39, %v1847_v10 }
  0x91   :  { %v1232_v46 = vpop.eup %1231  ;;  %v418_v45 = vadd.f32 1.0, %v1230_v59  ;;  %1237 = vtanh.f32 %v395_v60  ;;  %v367_v18 = vmul.f32 0.044715, %v351_v6  ;;  %v706_v4 = vmul.f32 %v690_v26, %v1803_v41 }
  0x92   :  { %v1234_v19 = vpop.eup %1233  ;;  %v438_v61 = vmul.f32 0.5, %v422_v36  ;;  %1239 = vtanh.f32 %v387_v9  ;;  %v782_v16 = vadd.f32 1.0, %v1232_v46  ;;  %v723_v21 = vmul.f32 0.044715, %v707_v48 }
  0x93   :  { %v1236_v30 = vpop.eup %1235  ;;  %v434_v57 = vmul.f32 0.5, %v418_v45  ;;  %1241 = vtanh.f32 %v391_v29  ;;  %v426_v20 = vadd.f32 1.0, %v1234_v19  ;;  %v383_v56 = vadd.f32 %v367_v18, %v1841_v49 }
  0x94   :  { %v454_v39 = vmul.f32 %v438_v61, %v1758_v63  ;;  %v798_v59 = vmul.f32 0.5, %v782_v16  ;;  %v430_v60 = vadd.f32 1.0, %v1236_v30  ;;  %v739_v6 = vadd.f32 %v723_v21, %v1844_v54 }
  0x95   :  { %v450_v26 = vmul.f32 %v434_v57, %v1761_v11  ;;  %v442_v36 = vmul.f32 0.5, %v426_v20  ;;  %v399_v9 = vmul.f32 0.7978846, %v383_v56  ;;  %v719_v46 = vmul.f32 0.044715, %v703_v44 }
  0x96   :  { %887 = vrot.lane.b32.xlu1 %v454_v39, %s1319_s24  ;;  %v1874_v48 = vmul.f32 %v798_v59, %v1764_v14  ;;  %v755_v29 = vmul.f32 0.7978846, %v739_v6  ;;  %v722_v19 = vmul.f32 0.044715, %v706_v4  ;;  %v446_v18 = vmul.f32 0.5, %v430_v60 }
  0x97   :  { %v1238_v45 = vpop.eup %1237  ;;  %836 = vrot.lane.b32.xlu2 %v450_v26, %s1319_s24  ;;  %1243 = vtanh.f32 %v399_v9  ;;  %v735_v61 = vadd.f32 %v719_v46, %v1847_v10  ;;  %v630_v63 = vsub.f32 1.5, %v629_v12  ;;  %v1879_v21 = vmul.f32 %v442_v36, %v1767_v55  ;;  %v1897_v9 = vpop.permute.xlu2 %253 }
  0x98   :  { %v1240_v16 = vpop.eup %1239  ;;  %v427_v11 = vadd.f32 1.0, %v1238_v45  ;;  %1245 = vtanh.f32 %v755_v29  ;;  %v738_v44 = vadd.f32 %v722_v19, %v1803_v41  ;;  %v617_v12 = vmul.f32 %v1830_v33, %v1776_v25 }
  0x99   :  { %v1242_v4 = vpop.eup %1241  ;;  %v419_v14 = vadd.f32 1.0, %v1240_v16  ;;  %v751_v30 = vmul.f32 0.7978846, %v735_v61  ;;  %v631_v57 = vmul.f32 %v1778_v35, %v630_v63  ;;  %vm623_vm8 = vweird.f32 %v1830_v33  ;;  %v1908_v63 = vpop.permute.xlu1 %293 }
  0x9a   :  { %v443_v20 = vmul.f32 0.5, %v427_v11  ;;  %v423_v56 = vadd.f32 1.0, %v1242_v4  ;;  %v754_v55 = vmul.f32 0.7978846, %v738_v44  ;;  %v618_v53 = vmul.f32 %v1830_v33, %v617_v12  ;;  %vm624_vm9 = vmor %vm622_vm7, %vm623_vm8  ;;  %v1929_v12 = vpop.permute.xlu0 %289 }
  0x9b   :  { %v435_v39 = vmul.f32 0.5, %v419_v14  ;;  %1247 = vtanh.f32 %v751_v30  ;;  %v1891_v59 = vsel %vm634_vm6, %v1778_v35, %v631_v57 }
  0x9c   :  { %v459_v60 = vmul.f32 %v443_v20, %v1815_v42  ;;  %v439_v6 = vmul.f32 0.5, %v423_v56  ;;  %1249 = vtanh.f32 %v754_v55  ;;  %v650_v26 = vmul.f32 %v1891_v59, %v1645_v23 }
  0x9d   :  { %v1244_v36 = vpop.eup %1243  ;;  %v451_v46 = vmul.f32 %v435_v39, %v1818_v50  ;;  %v619_v29 = vmul.f32 0.5, %v618_v53  ;;  %v651_v35 = vmul.f32 %v1891_v59, %v1647_v15  ;;  %v225_v23 = vmul.f32 %v1650_v34, %v1426_v2 }
  0x9e   :  { %v1246_v19 = vpop.eup %1245  ;;  %937 = vrot.lane.b32.xlu1 %v459_v60, %s1319_s24  ;;  %v455_v42 = vmul.f32 %v439_v6, %v1821_v28  ;;  %v431_v45 = vadd.f32 1.0, %v1244_v36  ;;  %v666_v61 = vmul.f32 %v650_v26, %v1741_v7  ;;  %v228_v15 = vmul.f32 %v1629_v62, %v1403_v51 }
  0x9f   :  { %838 = vrot.lane.b32.xlu0 %v451_v46, %s1319_s24  ;;  %v787_v50 = vadd.f32 1.0, %v1246_v19  ;;  %v620_v16 = vsub.f32 1.5, %v619_v29  ;;  %v667_v11 = vmul.f32 %v651_v35, %v1799_v43  ;;  %v462_v28 = vmul.f32 %v446_v18, %v1770_v47 }
  0xa0   :  { %889 = vrot.lane.b32.xlu2 %v455_v42, %s1319_s24  ;;  %v447_v44 = vmul.f32 0.5, %v431_v45  ;;  %v1917_v4 = vadd.f32 %v666_v61, %v1739_v58  ;;  %v265_v2 = vmul.f32 %v1897_v9, %v225_v23  ;;  %v268_v47 = vmul.f32 %v1866_v22, %v228_v15 }
  0xa1   :  { %v1248_v14 = vpop.eup %1247  ;;  %v803_v30 = vmul.f32 0.5, %v787_v50  ;;  %v621_v57 = vmul.f32 %v1830_v33, %v620_v16  ;;  %v1926_v51 = vadd.f32 %v667_v11, %v1809_v32  ;;  %v224_v55 = vmul.f32 %v1650_v34, %v1424_v1 }
  0xa2   :  { %v1250_v18 = vpop.eup %1249  ;;  %v783_v20 = vadd.f32 1.0, %v1248_v14  ;;  %v698_v56 = vmul.f32 %v1917_v4, %v1917_v4  ;;  %v1934_v25 = vadd.f32 %v1908_v63, %v265_v2  ;;  %v463_v39 = vmul.f32 %v447_v44, %v1841_v49 }
  0xa3   :  { %v786_v53 = vadd.f32 1.0, %v1250_v18  ;;  %v1940_v60 = vsel %vm624_vm9, %v1830_v33, %v621_v57  ;;  %v699_v6 = vmul.f32 %v1926_v51, %v1926_v51  ;;  %v1950_v1 = vmul.f32 %v803_v30, %v1844_v54 }
  0xa4   :  { %v799_v26 = vmul.f32 0.5, %v783_v20  ;;  %v714_v36 = vmul.f32 %v698_v56, %v1917_v4  ;;  %v646_v46 = vmul.f32 %v1940_v60, %v1685_v0  ;;  %v647_v29 = vmul.f32 %v1940_v60, %v1687_v13 }
  0xa5   :  { %v715_v34 = vmul.f32 %v699_v6, %v1926_v51  ;;  %v321_v33 = vmul.f32 %v1934_v25, %v1934_v25  ;;  %v1956_v49 = vadd.f32 %v1929_v12, %v268_v47  ;;  %v802_v35 = vmul.f32 0.5, %v786_v53 }
  0xa6   :  { %857 = vrot.lane.b32.xlu1 %v1874_v48, %s1322_s1  ;;  %v730_v0 = vmul.f32 0.044715, %v714_v36  ;;  %v662_v19 = vmul.f32 %v646_v46, %v1741_v7  ;;  %v663_v13 = vmul.f32 %v647_v29, %v1799_v43  ;;  %v1965_v54 = vmul.f32 %v799_v26, %v1847_v10 }
  0xa7   :  { %935 = vrot.lane.b32.xlu0 %v1879_v21, %s1319_s24  ;;  %v731_v42 = vmul.f32 0.044715, %v715_v34  ;;  %v337_v45 = vmul.f32 %v321_v33, %v1934_v25  ;;  %v324_v61 = vmul.f32 %v1956_v49, %v1956_v49  ;;  %v264_v21 = vmul.f32 %v1866_v22, %v224_v55 }
  0xa8   :  { %983 = vrot.lane.b32.xlu2 %v462_v28, %s1319_s24  ;;  %v746_v23 = vadd.f32 %v730_v0, %v1917_v4  ;;  %v1973_v7 = vadd.f32 %v662_v19, %v1739_v58  ;;  %v1976_v43 = vadd.f32 %v663_v13, %v1809_v32  ;;  %v232_v11 = vmul.f32 %v1714_v5, %v1453_v24 }
  0xa9   :  { %v747_v10 = vadd.f32 %v731_v42, %v1926_v51  ;;  %v353_v50 = vmul.f32 0.044715, %v337_v45  ;;  %v340_v16 = vmul.f32 %v324_v61, %v1956_v49  ;;  %v1988_v32 = vadd.f32 %v1929_v12, %v264_v21 }
  0xaa   :  { %v762_v15 = vmul.f32 0.7978846, %v746_v23  ;;  %v694_v28 = vmul.f32 %v1973_v7, %v1973_v7  ;;  %v695_v58 = vmul.f32 %v1976_v43, %v1976_v43  ;;  %v272_v30 = vmul.f32 %v1866_v22, %v232_v11 }
  0xab   :  { %v763_v44 = vmul.f32 0.7978846, %v747_v10  ;;  %v369_v2 = vadd.f32 %v353_v50, %v1934_v25  ;;  %v356_v14 = vmul.f32 0.044715, %v340_v16  ;;  %v320_v47 = vmul.f32 %v1988_v32, %v1988_v32 }
  0xac   :  { %1251 = vtanh.f32 %v762_v15  ;;  %v710_v57 = vmul.f32 %v694_v28, %v1973_v7  ;;  %v711_v24 = vmul.f32 %v695_v58, %v1976_v43  ;;  %v1998_v56 = vadd.f32 %v1929_v12, %v272_v30 }
  0xad   :  { %1253 = vtanh.f32 %v763_v44  ;;  %v385_v18 = vmul.f32 0.7978846, %v369_v2  ;;  %v372_v20 = vadd.f32 %v356_v14, %v1956_v49  ;;  %v336_v6 = vmul.f32 %v320_v47, %v1988_v32 }
  0xae   :  { %909 = vrot.lane.b32.xlu1 %v1950_v1, %s1322_s1  ;;  %v726_v55 = vmul.f32 0.044715, %v710_v57  ;;  %v727_v53 = vmul.f32 0.044715, %v711_v24  ;;  %v233_v26 = vmul.f32 %v1714_v5, %v1455_v27  ;;  %v2007_v36 = vmul.f32 %v802_v35, %v1803_v41 }
  0xaf   :  { %985 = vrot.lane.b32.xlu0 %v463_v39, %s1319_s24  ;;  %1255 = vtanh.f32 %v385_v18  ;;  %v328_v46 = vmul.f32 %v1998_v56, %v1998_v56  ;;  %v229_v29 = vmul.f32 %v1629_v62, %v1405_v52  ;;  %v352_v27 = vmul.f32 0.044715, %v336_v6 }
  0xb0   :  { %859 = vrot.lane.b32.xlu2 %v1965_v54, %s1322_s1  ;;  %v742_v34 = vadd.f32 %v726_v55, %v1973_v7  ;;  %v743_v33 = vadd.f32 %v727_v53, %v1976_v43  ;;  %v273_v5 = vmul.f32 %v1897_v9, %v233_v26  ;;  %v388_v39 = vmul.f32 0.7978846, %v372_v20 }
  0xb1   :  { %v344_v41 = vmul.f32 %v328_v46, %v1998_v56  ;;  %v269_v35 = vmul.f32 %v1897_v9, %v229_v29  ;;  %v237_v0 = vmul.f32 %v1721_v31, %v1526_v40  ;;  %v368_v13 = vadd.f32 %v352_v27, %v1988_v32 }
  0xb2   :  { %v1252_v19 = vpop.eup %1251  ;;  %v758_v52 = vmul.f32 0.7978846, %v742_v34  ;;  %v759_v62 = vmul.f32 0.7978846, %v743_v33  ;;  %v2024_v42 = vadd.f32 %v1908_v63, %v273_v5  ;;  %v236_v46 = vmul.f32 %v1721_v31, %v1524_v38 }
  0xb3   :  { %v1254_v45 = vpop.eup %1253  ;;  %v794_v61 = vadd.f32 1.0, %v1252_v19  ;;  %v360_v23 = vmul.f32 0.044715, %v344_v41  ;;  %v2027_v21 = vadd.f32 %v1908_v63, %v269_v35  ;;  %v277_v10 = vmul.f32 %v1897_v9, %v237_v0 }
  0xb4   :  { %1257 = vtanh.f32 %v758_v52  ;;  %v795_v50 = vadd.f32 1.0, %v1254_v45  ;;  %v384_v16 = vmul.f32 0.7978846, %v368_v13  ;;  %v329_v40 = vmul.f32 %v2024_v42, %v2024_v42 }
  0xb5   :  { %v1256_v11 = vpop.eup %1255  ;;  %v810_v15 = vmul.f32 0.5, %v794_v61  ;;  %1259 = vtanh.f32 %v759_v62  ;;  %v376_v28 = vadd.f32 %v360_v23, %v1998_v56  ;;  %v325_v58 = vmul.f32 %v2027_v21, %v2027_v21 }
  0xb6   :  { %v417_v44 = vadd.f32 1.0, %v1256_v11  ;;  %1261 = vtanh.f32 %v384_v16  ;;  %v345_v2 = vmul.f32 %v329_v40, %v2024_v42  ;;  %v2043_v24 = vadd.f32 %v1908_v63, %v277_v10 }
  0xb7   :  { %907 = vrot.lane.b32.xlu0 %v2007_v36, %s1322_s1  ;;  %v2039_v14 = vmul.f32 %v810_v15, %v1917_v4  ;;  %v392_v30 = vmul.f32 0.7978846, %v376_v28  ;;  %v341_v57 = vmul.f32 %v325_v58, %v2027_v21  ;;  %v811_v47 = vmul.f32 0.5, %v795_v50  ;;  %v2390_v58 = vld [vmem:[#allocation11_spill] sm:$0xff] }
  0xb8   :  { %v433_v18 = vmul.f32 0.5, %v417_v44  ;;  %1263 = vtanh.f32 %v388_v39  ;;  %v361_v20 = vmul.f32 0.044715, %v345_v2  ;;  %v333_v53 = vmul.f32 %v2043_v24, %v2043_v24 }
  0xb9   :  { %1003 = vrot.lane.b32.xlu1 %v2039_v14, %s1322_s1  ;;  %1265 = vtanh.f32 %v392_v30  ;;  %v357_v55 = vmul.f32 0.044715, %v341_v57  ;;  %v636_v4 = vmul.f32 %v1717_v37, %v1488_v3  ;;  %v2058_v35 = vmul.f32 %v811_v47, %v1926_v51  ;;  %v2391_v57 = vld [vmem:[#allocation7_spill] sm:$0xff] }
  0xba   :  { %v1258_v6 = vpop.eup %1257  ;;  %v377_v26 = vadd.f32 %v361_v20, %v2024_v42  ;;  %v349_v27 = vmul.f32 %v333_v53, %v2043_v24  ;;  %v276_v0 = vmul.f32 %v1866_v22, %v236_v46  ;;  %v449_v52 = vmul.f32 %v433_v18, %v1934_v25 }
  0xbb   :  { %v1260_v29 = vpop.eup %1259  ;;  %v790_v34 = vadd.f32 1.0, %v1258_v6  ;;  %v373_v33 = vadd.f32 %v357_v55, %v2027_v21  ;;  %v652_v5 = vmul.f32 %v636_v4, %v1866_v22  ;;  %v640_v28 = vmul.f32 %v1752_v8, %v1562_v17  ;;  %v2392_v17 = vld [vmem:[#allocation6_spill] sm:$0xff] }
  0xbc   :  { %v1262_v39 = vpop.eup %1261  ;;  %v791_v41 = vadd.f32 1.0, %v1260_v29  ;;  %v393_v3 = vmul.f32 0.7978846, %v377_v26  ;;  %v365_v31 = vmul.f32 0.044715, %v349_v27  ;;  %v2066_v61 = vadd.f32 %v1929_v12, %v276_v0 }
  0xbd   :  { %v806_v19 = vmul.f32 0.5, %v790_v34  ;;  %v389_v38 = vmul.f32 0.7978846, %v373_v33  ;;  %v2063_v45 = vadd.f32 %v652_v5, %v1929_v12  ;;  %v416_v10 = vadd.f32 1.0, %v1262_v39 }
  0xbe   :  { %v1264_v62 = vpop.eup %1263  ;;  %v807_v13 = vmul.f32 0.5, %v791_v41  ;;  %1267 = vtanh.f32 %v393_v3  ;;  %v381_v50 = vadd.f32 %v365_v31, %v2043_v24  ;;  %v332_v11 = vmul.f32 %v2066_v61, %v2066_v61 }
  0xbf   :  { %v1266_v23 = vpop.eup %1265  ;;  %v2069_v51 = vmul.f32 %v806_v19, %v1973_v7  ;;  %1269 = vtanh.f32 %v389_v38  ;;  %v684_v40 = vmul.f32 %v2063_v45, %v2063_v45  ;;  %v420_v7 = vadd.f32 1.0, %v1264_v62 }
  0xc0   :  { %v2073_v25 = vmul.f32 %v807_v13, %v1976_v43  ;;  %v424_v16 = vadd.f32 1.0, %v1266_v23  ;;  %v397_v15 = vmul.f32 0.7978846, %v381_v50  ;;  %v645_v43 = vmul.f32 %v1940_v60, %v2390_v58 }
  0xc1   :  { %955 = vrot.lane.b32.xlu2 %v2069_v51, %s1322_s1  ;;  %834 = vrot.lane.b32.xlu1 %v449_v52, %s1319_s24  ;;  %v700_v2 = vmul.f32 %v684_v40, %v2063_v45  ;;  %v348_v30 = vmul.f32 %v332_v11, %v2066_v61  ;;  %v641_v47 = vmul.f32 %v1752_v8, %v2391_v57  ;;  %v432_v4 = vmul.f32 0.5, %v416_v10 }
  0xc2   :  { %957 = vrot.lane.b32.xlu0 %v2073_v25, %s1322_s1  ;;  %v440_v44 = vmul.f32 0.5, %v424_v16  ;;  %1271 = vtanh.f32 %v397_v15  ;;  %v656_v18 = vmul.f32 %v640_v28, %v1866_v22  ;;  %v661_v20 = vmul.f32 %v645_v43, %v1897_v9  ;;  %v2393_v43 = vld [vmem:[#allocation8_spill] sm:$0xff] }
  0xc3   :  { %v637_v55 = vmul.f32 %v1717_v37, %v2392_v17  ;;  %v716_v6 = vmul.f32 0.044715, %v700_v2  ;;  %v364_v26 = vmul.f32 0.044715, %v348_v30  ;;  %v657_v46 = vmul.f32 %v641_v47, %v1897_v9  ;;  %v2394_v2 = vld [vmem:[#allocation10_spill] sm:$0xff] }
  0xc4   :  { %v1268_v53 = vpop.eup %1267  ;;  %v436_v34 = vmul.f32 0.5, %v420_v7  ;;  %v2098_v33 = vadd.f32 %v656_v18, %v1929_v12  ;;  %v2101_v8 = vadd.f32 %v661_v20, %v1908_v63  ;;  %v456_v3 = vmul.f32 %v440_v44, %v1998_v56  ;;  %v2395_v20 = vld [vmem:[#allocation9_spill] sm:$0xff] }
  0xc5   :  { %v1270_v29 = vpop.eup %1269  ;;  %v653_v27 = vmul.f32 %v637_v55, %v1897_v9  ;;  %v732_v39 = vadd.f32 %v716_v6, %v2063_v45  ;;  %v380_v37 = vadd.f32 %v364_v26, %v2066_v61  ;;  %v2107_v41 = vadd.f32 %v657_v46, %v1908_v63 }
  0xc6   :  { %v421_v5 = vadd.f32 1.0, %v1270_v29  ;;  %v688_v0 = vmul.f32 %v2098_v33, %v2098_v33  ;;  %v693_v19 = vmul.f32 %v2101_v8, %v2101_v8  ;;  %v448_v38 = vmul.f32 %v432_v4, %v1988_v32 }
  0xc7   :  { %v2115_v52 = vadd.f32 %v653_v27, %v1908_v63  ;;  %v748_v31 = vmul.f32 0.7978846, %v732_v39  ;;  %v396_v62 = vmul.f32 0.7978846, %v380_v37  ;;  %v689_v13 = vmul.f32 %v2107_v41, %v2107_v41 }
  0xc8   :  { %v1272_v23 = vpop.eup %1271  ;;  %v452_v56 = vmul.f32 %v436_v34, %v1956_v49  ;;  %v425_v10 = vadd.f32 1.0, %v1268_v53  ;;  %v704_v50 = vmul.f32 %v688_v0, %v2098_v33  ;;  %v709_v16 = vmul.f32 %v693_v19, %v2101_v8 }
  0xc9   :  { %1005 = vrot.lane.b32.xlu2 %v2058_v35, %s1322_s1  ;;  %931 = vrot.lane.b32.xlu1 %v456_v3, %s1319_s24  ;;  %v437_v32 = vmul.f32 0.5, %v421_v5  ;;  %v429_v40 = vadd.f32 1.0, %v1272_v23  ;;  %1273 = vtanh.f32 %v748_v31  ;;  %v705_v11 = vmul.f32 %v689_v13, %v2107_v41 }
  0xca   :  { %832 = vrot.lane.b32.xlu0 %v448_v38, %s1319_s24  ;;  %1275 = vtanh.f32 %v396_v62  ;;  %v720_v7 = vmul.f32 0.044715, %v704_v50  ;;  %v725_v15 = vmul.f32 0.044715, %v709_v16  ;;  %v685_v49 = vmul.f32 %v2115_v52, %v2115_v52 }
  0xcb   :  { %v445_v28 = vmul.f32 0.5, %v429_v40  ;;  %v721_v58 = vmul.f32 0.044715, %v705_v11  ;;  %v648_v44 = vmul.f32 %v1891_v59, %v2393_v43  ;;  %v644_v30 = vmul.f32 %v1940_v60, %v2394_v2 }
  0xcc   :  { %v736_v57 = vadd.f32 %v720_v7, %v2098_v33  ;;  %v741_v47 = vadd.f32 %v725_v15, %v2101_v8  ;;  %v701_v18 = vmul.f32 %v685_v49, %v2115_v52  ;;  %v649_v17 = vmul.f32 %v1891_v59, %v2395_v20 }
  0xcd   :  { %v461_v55 = vmul.f32 %v445_v28, %v2043_v24  ;;  %v737_v53 = vadd.f32 %v721_v58, %v2107_v41  ;;  %v664_v4 = vmul.f32 %v648_v44, %v1866_v22  ;;  %v660_v6 = vmul.f32 %v644_v30, %v1866_v22 }
  0xce   :  { %v752_v26 = vmul.f32 0.7978846, %v736_v57  ;;  %v757_v46 = vmul.f32 0.7978846, %v741_v47  ;;  %v717_v60 = vmul.f32 0.044715, %v701_v18  ;;  %v665_v29 = vmul.f32 %v649_v17, %v1897_v9 }
  0xcf   :  { %v1274_v34 = vpop.eup %1273  ;;  %v453_v27 = vmul.f32 %v437_v32, %v2027_v21  ;;  %v2146_v5 = vadd.f32 %v664_v4, %v1929_v12  ;;  %v2149_v59 = vadd.f32 %v660_v6, %v1929_v12  ;;  %v753_v21 = vmul.f32 0.7978846, %v737_v53 }
  0xd0   :  { %v1276_v24 = vpop.eup %1275  ;;  %1277 = vtanh.f32 %v752_v26  ;;  %v733_v22 = vadd.f32 %v717_v60, %v2115_v52  ;;  %v2155_v39 = vadd.f32 %v665_v29, %v1908_v63  ;;  %v441_v3 = vmul.f32 0.5, %v425_v10 }
  0xd1   :  { %883 = vrot.lane.b32.xlu2 %v452_v56, %s1319_s24  ;;  %981 = vrot.lane.b32.xlu1 %v461_v55, %s1319_s24  ;;  %v428_v9 = vadd.f32 1.0, %v1276_v24  ;;  %v696_v37 = vmul.f32 %v2146_v5, %v2146_v5  ;;  %v692_v12 = vmul.f32 %v2149_v59, %v2149_v59  ;;  %1279 = vtanh.f32 %v757_v46 }
  0xd2   :  { %885 = vrot.lane.b32.xlu0 %v453_v27, %s1319_s24  ;;  %v749_v0 = vmul.f32 0.7978846, %v733_v22  ;;  %v697_v19 = vmul.f32 %v2155_v39, %v2155_v39  ;;  %v457_v50 = vmul.f32 %v441_v3, %v2024_v42  ;;  %v780_v10 = vadd.f32 1.0, %v1274_v34 }
  0xd3   :  { %v444_v38 = vmul.f32 0.5, %v428_v9  ;;  %v712_v63 = vmul.f32 %v696_v37, %v2146_v5  ;;  %v708_v31 = vmul.f32 %v692_v12, %v2149_v59  ;;  %v1323_v3 = vmov 0.0  }
  0xd4   :  { %1281 = vtanh.f32 %v749_v0  ;;  %v713_v62 = vmul.f32 %v697_v19, %v2155_v39  ;;  %v796_v44 = vmul.f32 0.5, %v780_v10 }
  0xd5   :  { %1283 = vtanh.f32 %v753_v21  ;;  %v728_v13 = vmul.f32 0.044715, %v712_v63  ;;  %v724_v23 = vmul.f32 0.044715, %v708_v31  ;;  %v460_v32 = vmul.f32 %v444_v38, %v2066_v61  ;;  %v1175_v63 = vld [vmem:[%s2373_s3 + $0x10] sm:$0xf] }
  0xd6   :  { %v1278_v56 = vpop.eup %1277  ;;  %v729_v16 = vmul.f32 0.044715, %v713_v62  ;;  %v2180_v20 = vmul.f32 %v796_v44, %v2063_v45  ;;  %v1185_v31 = vld [vmem:[%s2373_s3 + $0x10] sm:$0x30]  ;;  %v1165_v44 = vld [vmem:[%s2373_s3] sm:$0xf] }
  0xd7   :  { %v784_v40 = vadd.f32 1.0, %v1278_v56  ;;  %v744_v11 = vadd.f32 %v728_v13, %v2146_v5  ;;  %v740_v7 = vadd.f32 %v724_v23, %v2149_v59  ;;  %v1280_v15 = vpop.eup %1279  ;;  %v1180_v56 = vld [vmem:[%s2373_s3 + $0x18] sm:$0xf] }
  0xd8   :  { %v745_v49 = vadd.f32 %v729_v16, %v2155_v39  ;;  %v789_v57 = vadd.f32 1.0, %v1280_v15 }
  0xd9   :  { %933 = vrot.lane.b32.xlu2 %v457_v50, %s1319_s24  ;;  %v800_v28 = vmul.f32 0.5, %v784_v40  ;;  %v760_v58 = vmul.f32 0.7978846, %v744_v11  ;;  %v756_v43 = vmul.f32 0.7978846, %v740_v7 }
  0xda   :  { %979 = vrot.lane.b32.xlu0 %v460_v32, %s1319_s24  ;;  %v1282_v42 = vpop.eup %1281  ;;  %v761_v2 = vmul.f32 0.7978846, %v745_v49  ;;  %v805_v55 = vmul.f32 0.5, %v789_v57  ;;  %v1170_v57 = vld [vmem:[%s2373_s3 + $0x8] sm:$0xf] }
  0xdb   :  { %v1284_v30 = vpop.eup %1283  ;;  %v2175_v61 = vmul.f32 %v800_v28, %v2098_v33  ;;  %v781_v47 = vadd.f32 1.0, %v1282_v42  ;;  %1285 = vtanh.f32 %v756_v43 }
  0xdc   :  { %1287 = vtanh.f32 %v760_v58  ;;  %v785_v17 = vadd.f32 1.0, %v1284_v30  ;;  %v2190_v26 = vmul.f32 %v805_v55, %v2101_v8 }
  0xdd   :  { %903 = vrot.lane.b32.xlu1 %v2175_v61, %s1322_s1  ;;  %v797_v18 = vmul.f32 0.5, %v781_v47  ;;  %1289 = vtanh.f32 %v761_v2  ;;  %v1183_v2 = vld [vmem:[%s2373_s3] sm:$0x30]  ;;  %v1184_v47 = vld [vmem:[%s2373_s3 + $0x8] sm:$0x30] }
  0xde   :  { %v801_v4 = vmul.f32 0.5, %v785_v17  ;;  %v1166_v30 = vor.u32 %v1183_v2, %v1165_v44 }
  0xdf   :  { %v2183_v53 = vmul.f32 %v797_v18, %v2115_v52 }
  0xe0   :  { %v2195_v52 = vmul.f32 %v801_v4, %v2107_v41  ;;  %v1066_v18 = vsel %vm1064_vm13, %v1166_v30, 0 }
  0xe1   :  { %853 = vrot.lane.b32.xlu2 %v2180_v20, %s1322_s1  ;;  %v1286_v33 = vpop.eup %1285  ;;  %1075 = vmatpush.bf16.msra.mxu0 %v1066_v18 }
  0xe2   :  { %855 = vrot.lane.b32.xlu0 %v2183_v53, %s1322_s1  ;;  %v1288_v6 = vpop.eup %1287  ;;  %v788_v45 = vadd.f32 1.0, %v1286_v33 }
  0xe3   :  { %v1290_v46 = vpop.eup %1289  ;;  %v792_v29 = vadd.f32 1.0, %v1288_v6 }
  0xe4   :  { %v804_v60 = vmul.f32 0.5, %v788_v45  ;;  %v793_v27 = vadd.f32 1.0, %v1290_v46 }
  0xe5   :  { %953 = vrot.lane.b32.xlu1 %v2190_v26, %s1322_s1  ;;  %v808_v8 = vmul.f32 0.5, %v792_v29  ;;  %v1205_v29 = vld [vmem:[%s2374_s4 + $0x2] ss:$0 sm:$0xff] }
  0xe6   :  { %v2198_v34 = vmul.f32 %v804_v60, %v2149_v59  ;;  %v809_v24 = vmul.f32 0.5, %v793_v27 }
  0xe7   :  { %v2205_v22 = vmul.f32 %v808_v8, %v2146_v5  ;;  %v1206_v8 = vld [vmem:[%s2374_s4 + $0x3] ss:$0 sm:$0xff] }
  0xe8   :  { %v2208_v41 = vmul.f32 %v809_v24, %v2155_v39 }
  0xe9   :  { %905 = vrot.lane.b32.xlu2 %v2195_v52, %s1322_s1 }
  0xea   :  { %951 = vrot.lane.b32.xlu0 %v2198_v34, %s1322_s1 }
  0xf1   :  { %999 = vrot.lane.b32.xlu2 %v2205_v22, %s1322_s1  ;;  %v837_v59 = vpop.permute.xlu2 %836 }
  0xf2   :  { %1001 = vrot.lane.b32.xlu0 %v2208_v41, %s1322_s1  ;;  %847 = vst.msk [vmem:[#allocation2 + $0x10] sm:$0x3] %vm844_vm10, %v837_v59 }
  0xfa   :  { %v890_v9 = vpop.permute.xlu2 %889 }
  0xfb   :  { %898 = vst.msk [vmem:[#allocation2 + $0x1a] sm:$0x3] %vm844_vm10, %v890_v9  ;;  %v1207_v9 = vld [vmem:[%s2374_s4] ss:$0 sm:$0xff] }
 0x102   :  { %v984_v21 = vpop.permute.xlu2 %983 }
 0x103   :  { %993 = vst.msk [vmem:[#allocation2 + $0x16] sm:$0x3] %vm844_vm10, %v984_v21 }
 0x108   :  { %v888_v5 = vpop.permute.xlu1 %887 }
 0x109   :  { %897 = vst.msk [vmem:[#allocation2 + $0x12] sm:$0x3] %vm844_vm10, %v888_v5 }
 0x10a   :  { %v860_v37 = vpop.permute.xlu2 %859 }
 0x110   :  { %v938_v39 = vpop.permute.xlu1 %937 }
 0x111   :  { %946 = vst.msk [vmem:[#allocation2 + $0x1c] sm:$0x3] %vm844_vm10, %v938_v39  ;;  %v839_v12 = vpop.permute.xlu0 %838  ;;  %v1208_v39 = vld [vmem:[%s2374_s4 + $0x1] ss:$0 sm:$0xff] }
 0x112   :  { %848 = vst.msk [vmem:[#allocation2 + $0x18] sm:$0x3] %vm844_vm10, %v839_v12 }
 0x113   :  { %869 = vst.msk [vmem:[#allocation2 + $0x18] sm:$0x3] %vm865_vm11, %v860_v37 }
 0x114   :  { %874 = vst.msk [vmem:[#allocation2 + $0x18] sm:$0x1] %vm870_vm12, %v1323_v3 }
 0x115   :  { %878 = vst.msk [vmem:[#allocation2 + $0x19] sm:$0x1] %vm870_vm12, %v1965_v54  ;;  %v1176_v54 = vor.u32 %v1185_v31, %v1175_v63 }
 0x117   :  { %v1114_v62 = vsel %vm1064_vm13, %v1176_v54, 0 }
 0x118   :  { %v858_v0 = vpop.permute.xlu1 %857  ;;  %1123 = vmatpush.bf16.msra.mxu2 %v1114_v62 }
 0x119   :  { %868 = vst.msk [vmem:[#allocation2 + $0x10] sm:$0x3] %vm865_vm11, %v858_v0  ;;  %v936_v19 = vpop.permute.xlu0 %935 }
 0x11a   :  { %873 = vst.msk [vmem:[#allocation2 + $0x10] sm:$0x1] %vm870_vm12, %v1323_v3 }
 0x11b   :  { %v956_v38 = vpop.permute.xlu2 %955  ;;  %877 = vst.msk [vmem:[#allocation2 + $0x11] sm:$0x1] %vm870_vm12, %v1874_v48 }
 0x11c   :  { %945 = vst.msk [vmem:[#allocation2 + $0x14] sm:$0x3] %vm844_vm10, %v936_v19 }
 0x11d   :  { %965 = vst.msk [vmem:[#allocation2 + $0x14] sm:$0x3] %vm865_vm11, %v956_v38 }
 0x11e   :  { %969 = vst.msk [vmem:[#allocation2 + $0x14] sm:$0x1] %vm870_vm12, %v1323_v3 }
 0x11f   :  { %973 = vst.msk [vmem:[#allocation2 + $0x15] sm:$0x1] %vm870_vm12, %v2069_v51  ;;  %v1186_v51 = vld [vmem:[%s2373_s3 + $0x18] sm:$0x30] }
 0x120   :  { %v910_v48 = vpop.permute.xlu1 %909  ;;  %v1181_v50 = vor.u32 %v1186_v51, %v1180_v56 }
 0x121   :  { %918 = vst.msk [vmem:[#allocation2 + $0x1a] sm:$0x3] %vm865_vm11, %v910_v48  ;;  %v986_v13 = vpop.permute.xlu0 %985 }
 0x122   :  { %922 = vst.msk [vmem:[#allocation2 + $0x1a] sm:$0x1] %vm870_vm12, %v1323_v3  ;;  %v1138_v10 = vsel %vm1064_vm13, %v1181_v50, 0 }
 0x123   :  { %v1006_v23 = vpop.permute.xlu2 %1005  ;;  %926 = vst.msk [vmem:[#allocation2 + $0x1b] sm:$0x1] %vm870_vm12, %v1950_v1  ;;  %1147 = vmatpush.bf16.msra.mxu3 %v1138_v10 }
 0x124   :  { %994 = vst.msk [vmem:[#allocation2 + $0x1e] sm:$0x3] %vm844_vm10, %v986_v13 }
 0x125   :  { %1014 = vst.msk [vmem:[#allocation2 + $0x1e] sm:$0x3] %vm865_vm11, %v1006_v23 }
 0x126   :  { %1018 = vst.msk [vmem:[#allocation2 + $0x1e] sm:$0x1] %vm870_vm12, %v1323_v3 }
 0x127   :  { %1022 = vst.msk [vmem:[#allocation2 + $0x1f] sm:$0x1] %vm870_vm12, %v2058_v35 }
 0x129   :  { %v908_v1 = vpop.permute.xlu0 %907 }
 0x12a   :  { %917 = vst.msk [vmem:[#allocation2 + $0x12] sm:$0x3] %vm865_vm11, %v908_v1 }
 0x12b   :  { %v884_v16 = vpop.permute.xlu2 %883  ;;  %v1004_v32 = vpop.permute.xlu1 %1003  ;;  %921 = vst.msk [vmem:[#allocation2 + $0x12] sm:$0x1] %vm870_vm12, %v1323_v3 }
 0x12c   :  { %895 = vst.msk [vmem:[#allocation2 + $0x2] sm:$0x3] %vm844_vm10, %v884_v16 }
 0x12d   :  { %1013 = vst.msk [vmem:[#allocation2 + $0x16] sm:$0x3] %vm865_vm11, %v1004_v32 }
 0x12e   :  { %1017 = vst.msk [vmem:[#allocation2 + $0x16] sm:$0x1] %vm870_vm12, %v1323_v3 }
 0x12f   :  { %1021 = vst.msk [vmem:[#allocation2 + $0x17] sm:$0x1] %vm870_vm12, %v2039_v14 }
 0x130   :  { %925 = vst.msk [vmem:[#allocation2 + $0x13] sm:$0x1] %vm870_vm12, %v2007_v36 }
 0x133   :  { %v934_v35 = vpop.permute.xlu2 %933  ;;  %v835_v40 = vpop.permute.xlu1 %834 }
 0x134   :  { %944 = vst.msk [vmem:[#allocation2 + $0xc] sm:$0x3] %vm844_vm10, %v934_v35  ;;  %v958_v11 = vpop.permute.xlu0 %957 }
 0x135   :  { %966 = vst.msk [vmem:[#allocation2 + $0x1c] sm:$0x3] %vm865_vm11, %v958_v11 }
 0x136   :  { %970 = vst.msk [vmem:[#allocation2 + $0x1c] sm:$0x1] %vm870_vm12, %v1323_v3 }
 0x137   :  { %974 = vst.msk [vmem:[#allocation2 + $0x1d] sm:$0x1] %vm870_vm12, %v2073_v25  ;;  %v1025_v7 = vld [vmem:[#allocation2 + $0x10] sm:$0xff] }
 0x138   :  { %846 = vst.msk [vmem:[#allocation2 + $0x8] sm:$0x3] %vm844_vm10, %v835_v40  ;;  %v1029_v14 = vpack.c.bf16 %v1025_v7, %v1025_v7 }
 0x13a   :  { %1177 = vmatmul.msk.bf16.vlgmr.msra.gmra.mxu2 %vm1060_vm14, %v1029_v14 }
 0x13b   :  { %v854_v36 = vpop.permute.xlu2 %853  ;;  %v932_v15 = vpop.permute.xlu1 %931 }
 0x13c   :  { %v833_v49 = vpop.permute.xlu0 %832  ;;  %943 = vst.msk [vmem:[#allocation2 + $0x4] sm:$0x3] %vm844_vm10, %v932_v15 }
 0x13d   :  { %845 = vst.msk [vmem:[#allocation2] sm:$0x3] %vm844_vm10, %v833_v49 }
 0x13e   :  { %866 = vst.msk [vmem:[#allocation2] sm:$0x3] %vm865_vm11, %v854_v36  ;;  %v1026_v28 = vld [vmem:[#allocation2 + $0x18] sm:$0xff] }
 0x13f   :  { %871 = vst.msk [vmem:[#allocation2] sm:$0x1] %vm870_vm12, %v1323_v3  ;;  %v1030_v25 = vpack.c.bf16 %v1026_v28, %v1026_v28 }
 0x140   :  { %875 = vst.msk [vmem:[#allocation2 + $0x1] sm:$0x1] %vm870_vm12, %v2180_v20  ;;  %v1171_v20 = vor.u32 %v1184_v47, %v1170_v57 }
 0x141   :  { %1182 = vmatmul.msk.bf16.vlgmr.msra.gmra.mxu3 %vm1060_vm14, %v1030_v25 }
 0x142   :  { %v1090_v55 = vsel %vm1064_vm13, %v1171_v20, 0 }
 0x143   :  { %v906_v58 = vpop.permute.xlu2 %905  ;;  %v982_v43 = vpop.permute.xlu1 %981  ;;  %1099 = vmatpush.bf16.msra.mxu1 %v1090_v55 }
 0x144   :  { %v886_v42 = vpop.permute.xlu0 %885  ;;  %992 = vst.msk [vmem:[#allocation2 + $0xe] sm:$0x3] %vm844_vm10, %v982_v43 }
 0x145   :  { %896 = vst.msk [vmem:[#allocation2 + $0xa] sm:$0x3] %vm844_vm10, %v886_v42 }
 0x146   :  { %916 = vst.msk [vmem:[#allocation2 + $0xa] sm:$0x3] %vm865_vm11, %v906_v58 }
 0x147   :  { %920 = vst.msk [vmem:[#allocation2 + $0xa] sm:$0x1] %vm870_vm12, %v1323_v3 }
 0x148   :  { %924 = vst.msk [vmem:[#allocation2 + $0xb] sm:$0x1] %vm870_vm12, %v2195_v52 }
 0x14b   :  { %v1000_v33 = vpop.permute.xlu2 %999 }
 0x14c   :  { %v980_v17 = vpop.permute.xlu0 %979 }
 0x14d   :  { %991 = vst.msk [vmem:[#allocation2 + $0x6] sm:$0x3] %vm844_vm10, %v980_v17 }
 0x14e   :  { %1011 = vst.msk [vmem:[#allocation2 + $0x6] sm:$0x3] %vm865_vm11, %v1000_v33 }
 0x14f   :  { %1015 = vst.msk [vmem:[#allocation2 + $0x6] sm:$0x1] %vm870_vm12, %v1323_v3  ;;  %v904_v4 = vpop.permute.xlu1 %903 }
 0x150   :  { %1019 = vst.msk [vmem:[#allocation2 + $0x7] sm:$0x1] %vm870_vm12, %v2205_v22 }
 0x151   :  { %915 = vst.msk [vmem:[#allocation2 + $0x2] sm:$0x3] %vm865_vm11, %v904_v4 }
 0x152   :  { %919 = vst.msk [vmem:[#allocation2 + $0x2] sm:$0x1] %vm870_vm12, %v1323_v3 }
 0x153   :  { %923 = vst.msk [vmem:[#allocation2 + $0x3] sm:$0x1] %vm870_vm12, %v2175_v61 }
 0x154   :  { %v856_v6 = vpop.permute.xlu0 %855 }
 0x155   :  { %867 = vst.msk [vmem:[#allocation2 + $0x8] sm:$0x3] %vm865_vm11, %v856_v6 }
 0x156   :  { %872 = vst.msk [vmem:[#allocation2 + $0x8] sm:$0x1] %vm870_vm12, %v1323_v3 }
 0x157   :  { %876 = vst.msk [vmem:[#allocation2 + $0x9] sm:$0x1] %vm870_vm12, %v2183_v53  ;;  %v954_v45 = vpop.permute.xlu1 %953 }
 0x158   :  { %964 = vst.msk [vmem:[#allocation2 + $0xc] sm:$0x3] %vm865_vm11, %v954_v45 }
 0x159   :  { %968 = vst.msk [vmem:[#allocation2 + $0xc] sm:$0x1] %vm870_vm12, %v1323_v3 }
 0x15a   :  { %972 = vst.msk [vmem:[#allocation2 + $0xd] sm:$0x1] %vm870_vm12, %v2190_v26 }
 0x15c   :  { %v952_v46 = vpop.permute.xlu0 %951 }
 0x15d   :  { %963 = vst.msk [vmem:[#allocation2 + $0x4] sm:$0x3] %vm865_vm11, %v952_v46 }
 0x15e   :  { %967 = vst.msk [vmem:[#allocation2 + $0x4] sm:$0x1] %vm870_vm12, %v1323_v3 }
 0x15f   :  { %971 = vst.msk [vmem:[#allocation2 + $0x5] sm:$0x1] %vm870_vm12, %v2198_v34 }
 0x164   :  { %v1002_v61 = vpop.permute.xlu0 %1001 }
 0x165   :  { %1012 = vst.msk [vmem:[#allocation2 + $0xe] sm:$0x3] %vm865_vm11, %v1002_v61 }
 0x166   :  { %1016 = vst.msk [vmem:[#allocation2 + $0xe] sm:$0x1] %vm870_vm12, %v1323_v3  ;;  %v1023_v53 = vld [vmem:[#allocation2] sm:$0xff] }
 0x167   :  { %1020 = vst.msk [vmem:[#allocation2 + $0xf] sm:$0x1] %vm870_vm12, %v2208_v41  ;;  %v1027_v26 = vpack.c.bf16 %v1023_v53, %v1023_v53 }
 0x169   :  { %1167 = vmatmul.msk.bf16.vlgmr.msra.gmra.mxu0 %vm1060_vm14, %v1027_v26 }
 0x16e   :  { %v1024_v60 = vld [vmem:[#allocation2 + $0x8] sm:$0xff] }
 0x16f   :  { %v1028_v52 = vpack.c.bf16 %v1024_v60, %v1024_v60 }
 0x171   :  { %1172 = vmatmul.msk.bf16.vlgmr.msra.gmra.mxu1 %vm1060_vm14, %v1028_v52 }
 0x1bd   :  { %v1125_v34 = vpop.f32.mrf.mxu2 }
 0x1be   :  { %v1126_v27 = vadd.f32 %v1205_v29, %v1125_v34 }
 0x1c0   :  { %1156 = vst.msk [vmem:[%s2375_s5 + $0x10] sm:$0xff] %vm1153_vm15, %v1126_v27 }
 0x1c4   :  { %v1149_v24 = vpop.f32.mrf.mxu3 }
 0x1c5   :  { %v1127_v22 = vpop.f32.mrf.mxu2  ;;  %v1150_v41 = vadd.f32 %v1206_v8, %v1149_v24 }
 0x1c7   :  { %1157 = vst.msk [vmem:[%s2375_s5 + $0x18] sm:$0xff] %vm1153_vm15, %v1150_v41 }
 0x1cc   :  { %v1151_v59 = vpop.f32.mrf.mxu3 }
 0x1e6   :  { %v1077_v21 = vpop.f32.mrf.mxu0 }
 0x1e7   :  { %v1078_v5 = vadd.f32 %v1207_v9, %v1077_v21 }
 0x1e9   :  { %1154 = vst.msk [vmem:[%s2375_s5] sm:$0xff] %vm1153_vm15, %v1078_v5 }
 0x1ee   :  { %v1079_v37 = vpop.f32.mrf.mxu0  ;;  %v1101_v12 = vpop.f32.mrf.mxu1 }
 0x1ef   :  { %v1102_v3 = vadd.f32 %v1208_v39, %v1101_v12 }
 0x1f1   :  { %1155 = vst.msk [vmem:[%s2375_s5 + $0x8] sm:$0xff] %vm1153_vm15, %v1102_v3 }
 0x1f6   :  { %v1103_v0 = vpop.f32.mrf.mxu1 }
 0x1f7   :  { %1162 = vsyncpa [#allocation4], 1 }

</bundles_post_ra>
